<compile_context>
chip_gen: v7x
topology: tpu7x:2x2x1
jax: 0.10.0
libtpu: 0.0.40
codegen_flags: <defaults>
</compile_context>

<pallas_src>
import functools

import jax
import jax.numpy as jnp
from jax import lax
from jax.experimental import pallas as pl
from jax.experimental.pallas import tpu as pltpu

BN_EPS = 1e-5


def conv3x3_kernel(x_ref, w_ref, scale_ref, bias_ref, y_ref, psum_ref, psumsq_ref,
                   *, apply_input_act: bool, padded_out: bool):
    """3x3 'same' conv as a single im2col matmul (K = 9*Cin) on the MXU.

    x_ref:   (H+2, W+2, Cin) zero-padded input tile, bf16. If apply_input_act,
             a folded-BatchNorm affine + ReLU is applied on the fly and the
             1-pixel halo is re-masked to zero (so padding stays zero).
    w_ref:   (9*Cin, Cout) im2col-flattened weights, bf16.
    y_ref:   pre-BN conv output; (H+2, W+2, Cout) zero-halo padded if padded_out
             (so the next conv can consume it directly), else (H, W, Cout).
    psum_ref / psumsq_ref: (1, Cout) per-grid-step partial channel sum and
             sum-of-squares of the f32 result (one-pass BN statistics).
    """
    Hp2, Wp2, Cin = x_ref.shape
    H, W = Hp2 - 2, Wp2 - 2
    Cout = w_ref.shape[1]

    if apply_input_act:
        xf = x_ref[...].astype(jnp.float32)
        a = jnp.maximum(xf * scale_ref[...] + bias_ref[...], 0.0)
        # Keep the zero padding zero after the affine (relu(bias) != 0 otherwise).
        hh = lax.broadcasted_iota(jnp.int32, (Hp2, Wp2, Cin), 0)
        ww = lax.broadcasted_iota(jnp.int32, (Hp2, Wp2, Cin), 1)
        interior = (hh >= 1) & (hh <= H) & (ww >= 1) & (ww <= W)
        a = jnp.where(interior, a, 0.0).astype(jnp.bfloat16)
    else:
        a = x_ref[...]                                   # already zero-padded, bf16

    # im2col: the 9 shifted 3x3 windows concatenated along the channel axis,
    # feeding ONE MXU matmul with K = 9*Cin (instead of 9 tiny matmuls).
    cols = []
    for dy in range(3):
        for dx in range(3):
            cols.append(a[dy:dy + H, dx:dx + W, :].reshape(H * W, Cin))
    patches = jnp.concatenate(cols, axis=-1)             # (H*W, 9*Cin) bf16

    acc = jnp.dot(patches, w_ref[...],
                  preferred_element_type=jnp.float32)    # (H*W, Cout) f32

    # One-pass BN statistics in f32 (partial sums; reduced across the batch grid
    # in the wrapper, keeping the grid axis "parallel").
    psum_ref[...] = jnp.sum(acc, axis=0, keepdims=True)
    psumsq_ref[...] = jnp.sum(acc * acc, axis=0, keepdims=True)

    if padded_out:
        y_ref[1:H + 1, 1:W + 1, :] = acc.reshape(H, W, Cout).astype(y_ref.dtype)
        # Zero only the 1-pixel halo ring (never the whole block).
        zrow = jnp.zeros((1, Wp2, Cout), y_ref.dtype)
        y_ref[0:1, :, :] = zrow
        y_ref[H + 1:H + 2, :, :] = zrow
        zcol = jnp.zeros((Hp2, 1, Cout), y_ref.dtype)
        y_ref[:, 0:1, :] = zcol
        y_ref[:, W + 1:W + 2, :] = zcol
    else:
        y_ref[...] = acc.reshape(H, W, Cout).astype(y_ref.dtype)


def bn_relu_kernel(y_ref, scale_ref, bias_ref, o_ref):
    """Lane-dense elementwise BN+ReLU epilogue on a (rows, W*Cout) view."""
    y = y_ref[...].astype(jnp.float32)
    o_ref[...] = jnp.maximum(y * scale_ref[...] + bias_ref[...], 0.0).astype(o_ref.dtype)


def _fold_bn(psum, psumsq, gamma, beta, count):
    """Fold training-mode batch stats (biased variance) into per-channel scale/bias."""
    s = jnp.sum(psum, axis=(0, 1))
    sq = jnp.sum(psumsq, axis=(0, 1))
    mean = s / count
    var = jnp.maximum(sq / count - mean * mean, 0.0)
    inv = lax.rsqrt(var + BN_EPS)
    scale = gamma * inv
    bias = beta - mean * scale
    return scale.astype(jnp.float32), bias.astype(jnp.float32)


def double_conv_forward(x_nchw, w1, g1, b1, w2, g2, b2):
    """x_nchw: (N, Cin, H, W); w1: (Cmid, Cin, 3, 3); w2: (Cout, Cmid, 3, 3)."""
    N, Cin, H, W = x_nchw.shape
    Cmid, Cout = w1.shape[0], w2.shape[0]
    out_dtype = x_nchw.dtype
    par = pltpu.CompilerParams(dimension_semantics=("parallel",))

    # NHWC + 1-pixel zero halo; bf16 matmul operands (f32 accumulation in-kernel).
    x = jnp.transpose(x_nchw, (0, 2, 3, 1))
    xpad = jnp.pad(x, ((0, 0), (1, 1), (1, 1), (0, 0))).astype(jnp.bfloat16)

    # im2col weight layout: K index = dy*3*Cin + dx*Cin + cin.
    w1_k = jnp.transpose(w1, (2, 3, 1, 0)).reshape(9 * Cin, Cmid).astype(jnp.bfloat16)
    w2_k = jnp.transpose(w2, (2, 3, 1, 0)).reshape(9 * Cmid, Cout).astype(jnp.bfloat16)

    # ---- pass 1: conv1 + BN1 partial stats (raw input, no activation) ----
    dummy_s = jnp.ones((1, Cin), jnp.float32)
    dummy_b = jnp.zeros((1, Cin), jnp.float32)
    y1pad, ps1, psq1 = pl.pallas_call(
        functools.partial(conv3x3_kernel, apply_input_act=False, padded_out=True),
        grid=(N,),
        in_specs=[
            pl.BlockSpec((None, H + 2, W + 2, Cin), lambda n: (n, 0, 0, 0)),
            pl.BlockSpec((9 * Cin, Cmid), lambda n: (0, 0)),
            pl.BlockSpec((1, Cin), lambda n: (0, 0)),
            pl.BlockSpec((1, Cin), lambda n: (0, 0)),
        ],
        out_specs=[
            pl.BlockSpec((None, H + 2, W + 2, Cmid), lambda n: (n, 0, 0, 0)),
            pl.BlockSpec((None, 1, Cmid), lambda n: (n, 0, 0)),
            pl.BlockSpec((None, 1, Cmid), lambda n: (n, 0, 0)),
        ],
        out_shape=[
            jax.ShapeDtypeStruct((N, H + 2, W + 2, Cmid), jnp.bfloat16),
            jax.ShapeDtypeStruct((N, 1, Cmid), jnp.float32),
            jax.ShapeDtypeStruct((N, 1, Cmid), jnp.float32),
        ],
        compiler_params=par,
    )(xpad, w1_k, dummy_s, dummy_b)

    count = float(N * H * W)
    scale1, bias1 = _fold_bn(ps1, psq1, g1, b1, count)

    # ---- pass 2: BN1+ReLU fused on the fly + conv2 + BN2 partial stats ----
    y2, ps2, psq2 = pl.pallas_call(
        functools.partial(conv3x3_kernel, apply_input_act=True, padded_out=False),
        grid=(N,),
        in_specs=[
            pl.BlockSpec((None, H + 2, W + 2, Cmid), lambda n: (n, 0, 0, 0)),
            pl.BlockSpec((9 * Cmid, Cout), lambda n: (0, 0)),
            pl.BlockSpec((1, Cmid), lambda n: (0, 0)),
            pl.BlockSpec((1, Cmid), lambda n: (0, 0)),
        ],
        out_specs=[
            pl.BlockSpec((None, H, W, Cout), lambda n: (n, 0, 0, 0)),
            pl.BlockSpec((None, 1, Cout), lambda n: (n, 0, 0)),
            pl.BlockSpec((None, 1, Cout), lambda n: (n, 0, 0)),
        ],
        out_shape=[
            jax.ShapeDtypeStruct((N, H, W, Cout), jnp.float32),
            jax.ShapeDtypeStruct((N, 1, Cout), jnp.float32),
            jax.ShapeDtypeStruct((N, 1, Cout), jnp.float32),
        ],
        compiler_params=par,
    )(y1pad, w2_k, scale1.reshape(1, Cmid), bias1.reshape(1, Cmid))

    scale2, bias2 = _fold_bn(ps2, psq2, g2, b2, count)

    # ---- pass 3: BN2+ReLU epilogue, lane-dense (last dim = W*Cout) ----
    y2_flat = y2.reshape(N * H, W * Cout)          # metadata-only view of the NHWC buffer
    scale2_t = jnp.tile(scale2, W).reshape(1, W * Cout)
    bias2_t = jnp.tile(bias2, W).reshape(1, W * Cout)
    out_flat = pl.pallas_call(
        bn_relu_kernel,
        grid=(N,),
        in_specs=[
            pl.BlockSpec((H, W * Cout), lambda n: (n, 0)),
            pl.BlockSpec((1, W * Cout), lambda n: (0, 0)),
            pl.BlockSpec((1, W * Cout), lambda n: (0, 0)),
        ],
        out_specs=pl.BlockSpec((H, W * Cout), lambda n: (n, 0)),
        out_shape=jax.ShapeDtypeStruct((N * H, W * Cout), jnp.float32),
        compiler_params=par,
    )(y2_flat, scale2_t, bias2_t)

    out_nhwc = out_flat.reshape(N, H, W, Cout).astype(out_dtype)
    return jnp.transpose(out_nhwc, (0, 3, 1, 2))   # -> NCHW


if __name__ == "__main__":
    key = jax.random.PRNGKey(0)
    kx, kw1, kw2, kg1, kb1, kg2, kb2 = jax.random.split(key, 7)

    N, Cin, H, W = 2, 4, 16, 16
    Cout = 8                                       # mid_channels == out_channels

    x = jax.random.normal(kx, (N, Cin, H, W), dtype=jnp.float32)

    # Deterministic synthetic parameters (shapes match nn.Conv2d / nn.BatchNorm2d).
    w1 = 0.1 * jax.random.normal(kw1, (Cout, Cin, 3, 3), dtype=jnp.float32)
    w2 = 0.1 * jax.random.normal(kw2, (Cout, Cout, 3, 3), dtype=jnp.float32)
    g1 = 1.0 + 0.1 * jax.random.normal(kg1, (Cout,), dtype=jnp.float32)
    b1 = 0.1 * jax.random.normal(kb1, (Cout,), dtype=jnp.float32)
    g2 = 1.0 + 0.1 * jax.random.normal(kg2, (Cout,), dtype=jnp.float32)
    b2 = 0.1 * jax.random.normal(kb2, (Cout,), dtype=jnp.float32)

    out = double_conv_forward(x, w1, g1, b1, w2, g2, b2)
    jax.block_until_ready(out)
    assert out.shape == (N, Cout, H, W), out.shape
    assert bool(jnp.all(jnp.isfinite(out)))
    print("KERNEL_OK")
</pallas_src>

<mosaic_0001>
module attributes {stable_mosaic.version = 11 : i64} {
  func.func @conv3x3_kernel(%arg0: i32, %arg1: memref<1x18x18x4xbf16, #tpu.memory_space<vmem>>, %arg2: memref<36x8xbf16, #tpu.memory_space<vmem>>, %arg3: memref<1x4xf32, #tpu.memory_space<vmem>>, %arg4: memref<1x4xf32, #tpu.memory_space<vmem>>, %arg5: memref<1x18x18x8xbf16, #tpu.memory_space<vmem>>, %arg6: memref<1x1x8xf32, #tpu.memory_space<vmem>>, %arg7: memref<1x1x8xf32, #tpu.memory_space<vmem>>) attributes {dimension_semantics = [#tpu.dimension_semantics<parallel>], iteration_bounds = array<i64: 2>, scalar_prefetch = 0 : i64, scratch_operands = 0 : i64, tpu.core_type = #tpu.core_type<tc>, window_params = [{transform_indices = @transform_0, window_bounds = array<i64: 1, 18, 18, 4>}, {pipeline_mode = #tpu.pipeline_mode<synchronous>, transform_indices = @transform_1, window_bounds = array<i64: 36, 8>}, {pipeline_mode = #tpu.pipeline_mode<synchronous>, transform_indices = @transform_2, window_bounds = array<i64: 1, 4>}, {pipeline_mode = #tpu.pipeline_mode<synchronous>, transform_indices = @transform_3, window_bounds = array<i64: 1, 4>}, {transform_indices = @transform_4, window_bounds = array<i64: 1, 18, 18, 8>}, {transform_indices = @transform_5, window_bounds = array<i64: 1, 1, 8>}, {transform_indices = @transform_6, window_bounds = array<i64: 1, 1, 8>}]} {
    %c0 = arith.constant 0 : index
    %c0_0 = arith.constant 0 : index
    %c0_1 = arith.constant 0 : index
    %c0_2 = arith.constant 0 : index
    %0 = vector.load %arg1[%c0, %c0_0, %c0_1, %c0_2] : memref<1x18x18x4xbf16, #tpu.memory_space<vmem>>, vector<1x18x18x4xbf16>
    %1 = vector.shape_cast %0 : vector<1x18x18x4xbf16> to vector<18x18x4xbf16>
    %2 = vector.extract_strided_slice %1 {offsets = [0, 0, 0], sizes = [16, 16, 4], strides = [1, 1, 1]} : vector<18x18x4xbf16> to vector<16x16x4xbf16>
    %3 = vector.shape_cast %2 : vector<16x16x4xbf16> to vector<256x4xbf16>
    %4 = vector.extract_strided_slice %1 {offsets = [0, 1, 0], sizes = [16, 16, 4], strides = [1, 1, 1]} : vector<18x18x4xbf16> to vector<16x16x4xbf16>
    %5 = vector.shape_cast %4 : vector<16x16x4xbf16> to vector<256x4xbf16>
    %6 = vector.extract_strided_slice %1 {offsets = [0, 2, 0], sizes = [16, 16, 4], strides = [1, 1, 1]} : vector<18x18x4xbf16> to vector<16x16x4xbf16>
    %7 = vector.shape_cast %6 : vector<16x16x4xbf16> to vector<256x4xbf16>
    %8 = vector.extract_strided_slice %1 {offsets = [1, 0, 0], sizes = [16, 16, 4], strides = [1, 1, 1]} : vector<18x18x4xbf16> to vector<16x16x4xbf16>
    %9 = vector.shape_cast %8 : vector<16x16x4xbf16> to vector<256x4xbf16>
    %10 = vector.extract_strided_slice %1 {offsets = [1, 1, 0], sizes = [16, 16, 4], strides = [1, 1, 1]} : vector<18x18x4xbf16> to vector<16x16x4xbf16>
    %11 = vector.shape_cast %10 : vector<16x16x4xbf16> to vector<256x4xbf16>
    %12 = vector.extract_strided_slice %1 {offsets = [1, 2, 0], sizes = [16, 16, 4], strides = [1, 1, 1]} : vector<18x18x4xbf16> to vector<16x16x4xbf16>
    %13 = vector.shape_cast %12 : vector<16x16x4xbf16> to vector<256x4xbf16>
    %14 = vector.extract_strided_slice %1 {offsets = [2, 0, 0], sizes = [16, 16, 4], strides = [1, 1, 1]} : vector<18x18x4xbf16> to vector<16x16x4xbf16>
    %15 = vector.shape_cast %14 : vector<16x16x4xbf16> to vector<256x4xbf16>
    %16 = vector.extract_strided_slice %1 {offsets = [2, 1, 0], sizes = [16, 16, 4], strides = [1, 1, 1]} : vector<18x18x4xbf16> to vector<16x16x4xbf16>
    %17 = vector.shape_cast %16 : vector<16x16x4xbf16> to vector<256x4xbf16>
    %18 = vector.extract_strided_slice %1 {offsets = [2, 2, 0], sizes = [16, 16, 4], strides = [1, 1, 1]} : vector<18x18x4xbf16> to vector<16x16x4xbf16>
    %19 = vector.shape_cast %18 : vector<16x16x4xbf16> to vector<256x4xbf16>
    %20 = tpu.concatenate %3, %5, %7, %9, %11, %13, %15, %17, %19 in 1 : vector<256x4xbf16>, vector<256x4xbf16>, vector<256x4xbf16>, vector<256x4xbf16>, vector<256x4xbf16>, vector<256x4xbf16>, vector<256x4xbf16>, vector<256x4xbf16>, vector<256x4xbf16> -> vector<256x36xbf16>
    %c0_3 = arith.constant 0 : index
    %c0_4 = arith.constant 0 : index
    %21 = vector.load %arg2[%c0_3, %c0_4] : memref<36x8xbf16, #tpu.memory_space<vmem>>, vector<36x8xbf16>
    %cst = arith.constant dense<0.000000e+00> : vector<256x8xf32>
    %22 = tpu.matmul %20, %21, %cst {dimension_numbers = #tpu.dot_dimension_numbers<[1], [0], [0], [1], [0, 0, 1, 1], [], []>} : vector<256x36xbf16>, vector<36x8xbf16>, vector<256x8xf32> -> vector<256x8xf32>
    %cst_5 = arith.constant dense<0.000000e+00> : vector<8xf32>
    %23 = vector.multi_reduction <add>, %22, %cst_5 [0] : vector<256x8xf32> to vector<8xf32>
    %24 = vector.shape_cast %23 : vector<8xf32> to vector<1x8xf32>
    %c0_6 = arith.constant 0 : index
    %c0_7 = arith.constant 0 : index
    %c0_8 = arith.constant 0 : index
    %25 = vector.load %arg6[%c0_6, %c0_7, %c0_8] : memref<1x1x8xf32, #tpu.memory_space<vmem>>, vector<1x1x8xf32>
    %26 = vector.shape_cast %25 : vector<1x1x8xf32> to vector<1x8xf32>
    %27 = vector.shape_cast %24 : vector<1x8xf32> to vector<1x1x8xf32>
    tpu.vector_store %arg6[%c0_6, %c0_7, %c0_8], %27 {strides = array<i32>} : memref<1x1x8xf32, #tpu.memory_space<vmem>>, vector<1x1x8xf32>,
    %28 = arith.mulf %22, %22 : vector<256x8xf32>
    %cst_9 = arith.constant dense<0.000000e+00> : vector<8xf32>
    %29 = vector.multi_reduction <add>, %28, %cst_9 [0] : vector<256x8xf32> to vector<8xf32>
    %30 = vector.shape_cast %29 : vector<8xf32> to vector<1x8xf32>
    %c0_10 = arith.constant 0 : index
    %c0_11 = arith.constant 0 : index
    %c0_12 = arith.constant 0 : index
    %31 = vector.load %arg7[%c0_10, %c0_11, %c0_12] : memref<1x1x8xf32, #tpu.memory_space<vmem>>, vector<1x1x8xf32>
    %32 = vector.shape_cast %31 : vector<1x1x8xf32> to vector<1x8xf32>
    %33 = vector.shape_cast %30 : vector<1x8xf32> to vector<1x1x8xf32>
    tpu.vector_store %arg7[%c0_10, %c0_11, %c0_12], %33 {strides = array<i32>} : memref<1x1x8xf32, #tpu.memory_space<vmem>>, vector<1x1x8xf32>,
    %34 = vector.shape_cast %22 : vector<256x8xf32> to vector<16x16x8xf32>
    %35 = arith.truncf %34 : vector<16x16x8xf32> to vector<16x16x8xbf16>
    %c0_13 = arith.constant 0 : index
    %c1 = arith.constant 1 : index
    %c1_14 = arith.constant 1 : index
    %c0_15 = arith.constant 0 : index
    %36 = vector.load %arg5[%c0_13, %c1, %c1_14, %c0_15] : memref<1x18x18x8xbf16, #tpu.memory_space<vmem>>, vector<1x16x16x8xbf16>
    %37 = vector.shape_cast %36 : vector<1x16x16x8xbf16> to vector<16x16x8xbf16>
    %38 = vector.shape_cast %35 : vector<16x16x8xbf16> to vector<1x16x16x8xbf16>
    tpu.vector_store %arg5[%c0_13, %c1, %c1_14, %c0_15], %38 {strides = array<i32>} : memref<1x18x18x8xbf16, #tpu.memory_space<vmem>>, vector<1x16x16x8xbf16>,
    %cst_16 = arith.constant 0.000000e+00 : bf16
    %39 = vector.broadcast %cst_16 : bf16 to vector<1x18x8xbf16>
    %c0_17 = arith.constant 0 : index
    %c0_18 = arith.constant 0 : index
    %c0_19 = arith.constant 0 : index
    %c0_20 = arith.constant 0 : index
    %40 = vector.load %arg5[%c0_17, %c0_18, %c0_19, %c0_20] : memref<1x18x18x8xbf16, #tpu.memory_space<vmem>>, vector<1x1x18x8xbf16>
    %41 = vector.shape_cast %40 : vector<1x1x18x8xbf16> to vector<1x18x8xbf16>
    %42 = vector.shape_cast %39 : vector<1x18x8xbf16> to vector<1x1x18x8xbf16>
    tpu.vector_store %arg5[%c0_17, %c0_18, %c0_19, %c0_20], %42 {strides = array<i32>} : memref<1x18x18x8xbf16, #tpu.memory_space<vmem>>, vector<1x1x18x8xbf16>,
    %c0_21 = arith.constant 0 : index
    %c17 = arith.constant 17 : index
    %c0_22 = arith.constant 0 : index
    %c0_23 = arith.constant 0 : index
    %43 = vector.load %arg5[%c0_21, %c17, %c0_22, %c0_23] : memref<1x18x18x8xbf16, #tpu.memory_space<vmem>>, vector<1x1x18x8xbf16>
    %44 = vector.shape_cast %43 : vector<1x1x18x8xbf16> to vector<1x18x8xbf16>
    %45 = vector.shape_cast %39 : vector<1x18x8xbf16> to vector<1x1x18x8xbf16>
    tpu.vector_store %arg5[%c0_21, %c17, %c0_22, %c0_23], %45 {strides = array<i32>} : memref<1x18x18x8xbf16, #tpu.memory_space<vmem>>, vector<1x1x18x8xbf16>,
    %cst_24 = arith.constant 0.000000e+00 : bf16
    %46 = vector.broadcast %cst_24 : bf16 to vector<18x1x8xbf16>
    %c0_25 = arith.constant 0 : index
    %c0_26 = arith.constant 0 : index
    %c0_27 = arith.constant 0 : index
    %c0_28 = arith.constant 0 : index
    %47 = vector.load %arg5[%c0_25, %c0_26, %c0_27, %c0_28] : memref<1x18x18x8xbf16, #tpu.memory_space<vmem>>, vector<1x18x1x8xbf16>
    %48 = vector.shape_cast %47 : vector<1x18x1x8xbf16> to vector<18x1x8xbf16>
    %49 = vector.shape_cast %46 : vector<18x1x8xbf16> to vector<1x18x1x8xbf16>
    tpu.vector_store %arg5[%c0_25, %c0_26, %c0_27, %c0_28], %49 {strides = array<i32>} : memref<1x18x18x8xbf16, #tpu.memory_space<vmem>>, vector<1x18x1x8xbf16>,
    %c0_29 = arith.constant 0 : index
    %c0_30 = arith.constant 0 : index
    %c17_31 = arith.constant 17 : index
    %c0_32 = arith.constant 0 : index
    %50 = vector.load %arg5[%c0_29, %c0_30, %c17_31, %c0_32] : memref<1x18x18x8xbf16, #tpu.memory_space<vmem>>, vector<1x18x1x8xbf16>
    %51 = vector.shape_cast %50 : vector<1x18x1x8xbf16> to vector<18x1x8xbf16>
    %52 = vector.shape_cast %46 : vector<18x1x8xbf16> to vector<1x18x1x8xbf16>
    tpu.vector_store %arg5[%c0_29, %c0_30, %c17_31, %c0_32], %52 {strides = array<i32>} : memref<1x18x18x8xbf16, #tpu.memory_space<vmem>>, vector<1x18x1x8xbf16>,
    return
  }
  func.func @transform_0(%arg0: i32) -> (i32, i32, i32, i32) {
    %c0_i32 = arith.constant 0 : i32
    %c0_i32_0 = arith.constant 0 : i32
    %c0_i32_1 = arith.constant 0 : i32
    %c0_i32_2 = arith.constant 0 : i32
    return %arg0, %c0_i32, %c0_i32_0, %c0_i32_1 : i32, i32, i32, i32
  }
  func.func @transform_1(%arg0: i32) -> (i32, i32) {
    %c0_i32 = arith.constant 0 : i32
    %c0_i32_0 = arith.constant 0 : i32
    %c0_i32_1 = arith.constant 0 : i32
    return %c0_i32, %c0_i32_0 : i32, i32
  }
  func.func @transform_2(%arg0: i32) -> (i32, i32) {
    %c0_i32 = arith.constant 0 : i32
    %c0_i32_0 = arith.constant 0 : i32
    %c0_i32_1 = arith.constant 0 : i32
    return %c0_i32, %c0_i32_0 : i32, i32
  }
  func.func @transform_3(%arg0: i32) -> (i32, i32) {
    %c0_i32 = arith.constant 0 : i32
    %c0_i32_0 = arith.constant 0 : i32
    %c0_i32_1 = arith.constant 0 : i32
    return %c0_i32, %c0_i32_0 : i32, i32
  }
  func.func @transform_4(%arg0: i32) -> (i32, i32, i32, i32) {
    %c0_i32 = arith.constant 0 : i32
    %c0_i32_0 = arith.constant 0 : i32
    %c0_i32_1 = arith.constant 0 : i32
    %c0_i32_2 = arith.constant 0 : i32
    return %arg0, %c0_i32, %c0_i32_0, %c0_i32_1 : i32, i32, i32, i32
  }
  func.func @transform_5(%arg0: i32) -> (i32, i32, i32) {
    %c0_i32 = arith.constant 0 : i32
    %c0_i32_0 = arith.constant 0 : i32
    %c0_i32_1 = arith.constant 0 : i32
    return %arg0, %c0_i32, %c0_i32_0 : i32, i32, i32
  }
  func.func @transform_6(%arg0: i32) -> (i32, i32, i32) {
    %c0_i32 = arith.constant 0 : i32
    %c0_i32_0 = arith.constant 0 : i32
    %c0_i32_1 = arith.constant 0 : i32
    return %arg0, %c0_i32, %c0_i32_0 : i32, i32, i32
  }
}

</mosaic_0001>

<bundles_post_ra>
// kernel: tpu_custom_call.1
= control target key start
LH: loop header
LB: loop body
LE: loop exit
PB: predicated region body
PF: predicated region fallthrough
CT: control target
= control target key end

     0   :  { %12 = vsyncpa [#allocation3], 0  ;;  %s4826_s0 = inlined_call_operand.vmem [shape: bf16[2,18,18,4], index: 0, kind: input, shape index: {}]   ;;  %s4827_s1 = inlined_call_operand.vmem [shape: bf16[36,8], index: 1, kind: input, shape index: {}]   ;;  %s4828_s2 = inlined_call_operand.vmem [shape: f32[1,4], index: 2, kind: input, shape index: {}]   ;;  %s4829_s3 = inlined_call_operand.vmem [shape: f32[1,4], index: 3, kind: input, shape index: {}]   ;;  %s4830_s4 = inlined_call_operand.vmem [shape: bf16[2,18,18,8], index: 4, kind: output, shape index: {0}]   ;;  %s4831_s5 = inlined_call_operand.hbm [shape: f32[2,1,8], index: 5, kind: output, shape index: {1}]   ;;  %s4832_s6 = inlined_call_operand.hbm [shape: f32[2,1,8], index: 6, kind: output, shape index: {2}]  }
   0x1   :  { %14 = vsyncpa [#allocation3 + $0x1], 0 }
   0x2   :  { %15 = vsyncpa [#allocation5], 0 }
   0x3   :  { %17 = vsyncpa [#allocation5 + $0x1], 0  ;;  %s3363_s21 = smov 0   ;;  %s3365_s22 = smov 0  }
   0x4   :  { %s3367_s2 = smov 0   ;;  %s3369_s3 = smov 0  }
   0x5 LB: > { %s3384_s23 = sadd.s32 4294967295, %s3315_s3   ;;  %s2833_s24 = sadd.s32 4294967294, %s3315_s3   ;;  %s3315_s3 = sphi %s3369_s3, %s4850_s3   ;;  %s3311_s2 = sphi %s3367_s2, %s4849_s2   ;;  %s3307_s22 = sphi %s3365_s22, %s4848_s22   ;;  %s3303_s21 = sphi %s3363_s21, %s4847_s21  }
   0x6   : > { %s3388_s25 = sadd.s32 1, %s3315_s3   ;;  %s145_s26 = sadd.s32 1, %s3311_s2 }
   0x7   : > { %s142_s27 = ssub.s32 %s3315_s3, %s3388_s25  ;;  %p155_p0 = scmp.ne.s32.totalorder %s3311_s2, %s3307_s22 }
   0x8   : > { %p143_p1 = scmp.eq.s32.totalorder %s142_s27, 0  ;;  %p156_p2 = scmp.eq.s32.totalorder %s3384_s23, 1 }
   0x9   : > { %p161_p3 = scmp.ne.s32.totalorder %s3307_s22, %s3303_s21  ;;  %p162_p4 = scmp.eq.s32.totalorder %s2833_s24, 1 }
   0xa   : > { %s3399_s28 = scalar_select %p143_p1, %s3311_s2, %s145_s26  }
   0xb   : > { %p3401_p5 = por %p156_p2, %p155_p0  ;;  %p3405_p6 = por %p162_p4, %p161_p3 }
   0xc   : > { %p2836_p7 = scmp.ge.s32.totalorder %s3315_s3, 1  ;;  %p223_p8 = scmp.lt.s32.totalorder %s3315_s3, 3 }
   0xe   : > { %p224_p9 = pnand %p2836_p7, %p223_p8 }
   0xf   : > { %p261_p10 = scmp.lt.s32.totalorder (!%p224_p9), %s3384_s23, 1  ;;  %vm761_vm0 = vcmask (!%p224_p9), 1042432   ;;  %vm762_vm1 = vcmask (!%p224_p9), 1046532   ;;  %vm326_vm2 = vsmask.f32 (!%p224_p9), 3328  ;;  %s3317_s12 = smov (!%p224_p9), 12  }
  0x10   : > { %227 = sbr.rel (%p224_p9) target bundleno = 685 (0x2ad), region = 36  ;;  %vm327_vm3 = vsmask.f32 (!%p224_p9), 7440  ;;  %vm3443_vm4 = vmor (!%p224_p9), %vm761_vm0, %vm762_vm1  ;;  %s3318_s13 = smov (!%p224_p9), 20   ;;  %vm1695_vm6 = vcmask (!%p224_p9), 1041408   ;;  %vm1362_vm7 = vcmask (!%p224_p9), 31744  }
  0x11   : > { %vm3478_vm5 = vmor (!%p224_p9), %vm326_vm2, %vm327_vm3  ;;  %s3319_s14 = smov (!%p224_p9), 8   ;;  %s3320_s15 = smov (!%p224_p9), 4   ;;  %vm1411_vm8 = vcmask (!%p224_p9), 64512   ;;  %vm1444_vm9 = vcmask (!%p224_p9), 97280   ;;  %vm1477_vm10 = vcmask (!%p224_p9), 130048   ;;  %vm1510_vm11 = vcmask (!%p224_p9), 162816  }
  0x12   : > { %s3321_s20 = smov (!%p224_p9), 16   ;;  %s3322_s24 = smov (!%p224_p9), 24   ;;  %vm1543_vm12 = vcmask (!%p224_p9), 195584   ;;  %vm1576_vm13 = vcmask (!%p224_p9), 228352   ;;  %vm1609_vm14 = vcmask (!%p224_p9), 261120   ;;  %vm1662_vm15 = vcmask (!%p224_p9), 293888  }
  0x13   : > { %s3323_s26 = smov (!%p224_p9), 28   ;;  %s3324_s27 = smov (!%p224_p9), 32   ;;  %vm2453_vm0 = vcmask (!%p224_p9), 60416   ;;  %vm1929_vm1 = vcmask (!%p224_p9), 57344   ;;  %vm2129_vm2 = vsmask.f32 (!%p224_p9), 256 }
  0x14   : > { %vm2454_vm3 = vsmask.f32 (!%p224_p9), 7938  ;;  %s3326_s10 = smov (!%p224_p9), [#allocation2]  }
  0x17   : > { %s3413_s7 = scalar_select %p261_p10, %s3384_s23, 1 }
  0x19   : > { %s3146_s8 = smul.u32 216, %s3413_s7  ;;  %s4721_s7 = sand.u32 1, %s3307_s22  }
  0x1a   : > { %s260_s16 = scalar_lea.vmem [#allocation4], %s4721_s7 }
  0x1b   : > { %s3421_s11 = scalar_lea.vmem %s4826_s0, %s3146_s8  ;;  %s2725_s17 = sshll.u32 %s260_s16, 4  ;;  %s4760_s17 = int_to_ptr.vmem [resolvable:$true] %s2725_s17 }
  0x1c   : > { %v3424_v0 = vld [vmem:[%s3421_s11 + $0x18] sm:$0xf]  ;;  %v3427_v1 = vld [vmem:[%s3421_s11 + $0x1c] sm:$0xf]  ;;  %v275_v2 = vld [vmem:[%s3421_s11 + $0xc] sm:$0xf] }
  0x1d   : > { %v391_v3 = vshrl.u32 %v3427_v1, 16  ;;  %v3433_v4 = vcombine.low %v3424_v0, %v3427_v1  ;;  %v378_v5 = vshrl.u32 %v3424_v0, 16  ;;  %v381_v6 = vshll.u32 %v3424_v0, 16  ;;  %v276_v7 = vld [vmem:[%s3421_s11 + $0x10] sm:$0xf] }
  0x1e   : > { %v363_v8 = vshll.u32 %v276_v7, 16  ;;  %v367_v9 = vshrl.u32 %v276_v7, 16  ;;  %v3438_v10 = vcombine.low %v275_v2, %v276_v7  ;;  %v354_v11 = vshrl.u32 %v275_v2, 16  ;;  %v277_v12 = vld [vmem:[%s3421_s11 + $0x14] sm:$0x1] }
  0x1f   : > { %1157 = vrot.lane.b32.xlu1 %v3433_v4, %s3317_s12  ;;  %v357_v14 = vshll.u32 %v275_v2, 16  ;;  %v2840_v15 = vrot.slane %v275_v2, 9  ;;  %v773_v16 = vrot.slane %v276_v7, 5  ;;  %v776_v17 = vrot.slane %v277_v12, 5  ;;  %v3450_v18 = vld [vmem:[%s3421_s11] sm:$0xf] }
  0x20   : > { %v369_v19 = vrot.slane %v367_v9, 4  ;;  %1155 = vrot.lane.b32.xlu0 %v3438_v10, %s3317_s12  ;;  %v356_v20 = vrot.slane %v354_v11, 4  ;;  %v3455_v21 = vld [vmem:[%s3421_s11 + $0x4] sm:$0xf]  ;;  %v274_v22 = vld [vmem:[%s3421_s11 + $0x8] sm:$0x1] }
  0x21   : > { %v359_v23 = vrot.slane %v357_v14, 5  ;;  %v774_v24 = vsel %vm3443_vm4, %v2840_v15, %v773_v16  ;;  %v775_v25 = vrot.slane %v773_v16, 4  ;;  %v2839_v26 = vrot.slane %v3450_v18, 9  ;;  %v280_v35 = vld [vmem:[%s3421_s11 + $0x20] sm:$0x1] }
  0x22   : > { %v766_v27 = vrot.slane %v3455_v21, 5  ;;  %v769_v28 = vrot.slane %v274_v22, 5  ;;  %v330_v29 = vshrl.u32 %v3450_v18, 16  ;;  %v333_v30 = vshll.u32 %v3450_v18, 16  ;;  %v3492_v7 = vld [vmem:[%s3421_s11 + $0x24] sm:$0xf] }
  0x23   : > { %v777_v31 = vsel %vm3443_vm4, %v775_v25, %v776_v17  ;;  %v339_v32 = vshll.u32 %v3455_v21, 16  ;;  %v343_v33 = vshrl.u32 %v3455_v21, 16  ;;  %v349_v34 = vshll.u32 %v274_v22, 16 }
  0x24   : > { %v2890_v36 = vcombine.low %v774_v24, %v777_v31  ;;  %v767_v37 = vsel %vm3443_vm4, %v2839_v26, %v766_v27  ;;  %v768_v38 = vrot.slane %v766_v27, 4  ;;  %v332_v39 = vrot.slane %v330_v29, 4  ;;  %v283_v26 = vld [vmem:[%s3421_s11 + $0x2c] sm:$0x1] }
  0x25   : > { %v335_v40 = vrot.slane %v333_v30, 5  ;;  %v341_v41 = vrot.slane %v339_v32, 5  ;;  %v345_v42 = vrot.slane %v343_v33, 4  ;;  %v351_v43 = vrot.slane %v349_v34, 5  ;;  %v3212_v34 = vld [vmem:[%s4827_s1 + $0x8] sm:$0xff]  }
  0x26   : > { %1225 = vrot.lane.b32.xlu0 %v2890_v36, %s3318_s13  ;;  %v770_v44 = vsel %vm3443_vm4, %v768_v38, %v769_v28  ;;  %v2841_v45 = vrot.slane %v3424_v0, 9  ;;  %v780_v46 = vrot.slane %v3427_v1, 5  ;;  %v783_v47 = vrot.slane %v280_v35, 5 }
  0x27   : > { %v2889_v48 = vcombine.low %v767_v37, %v770_v44  ;;  %v336_v49 = vor.u32 %v335_v40, %v332_v39  ;;  %v346_v50 = vor.u32 %v345_v42, %v341_v41  ;;  %v360_v51 = vor.u32 %v359_v23, %v356_v20 }
  0x28   : > { %v781_v53 = vsel %vm3443_vm4, %v2841_v45, %v780_v46  ;;  %v782_v54 = vrot.slane %v780_v46, 4  ;;  %v365_v55 = vrot.slane %v363_v8, 5  ;;  %v373_v56 = vshll.u32 %v277_v12, 16  ;;  %v3503_v12 = vld [vmem:[%s3421_s11 + $0x28] sm:$0xf] }
  0x29   : > { %1120 = vrot.lane.b32.xlu1 %v2889_v48, %s3319_s14  ;;  %v337_v57 = vrot.slane %v336_v49, 4  ;;  %v347_v58 = vrot.slane %v346_v50, 4  ;;  %v361_v59 = vrot.slane %v360_v51, 4  ;;  %v380_v60 = vrot.slane %v378_v5, 4  ;;  %v284_v49 = vld [vmem:[%s3421_s11 + $0x30] sm:$0xf] }
  0x2a   : > { %v784_v61 = vsel %vm3443_vm4, %v782_v54, %v783_v47  ;;  %v370_v62 = vor.u32 %v369_v19, %v365_v55  ;;  %v375_v63 = vrot.slane %v373_v56, 5  ;;  %v383_v2 = vrot.slane %v381_v6, 5  ;;  %v285_v50 = vld [vmem:[%s3421_s11 + $0x34] sm:$0xf] }
  0x2b   : > { %v342_v8 = vsel %vm3478_vm5, %v337_v57, %v341_v41  ;;  %v352_v9 = vsel %vm3478_vm5, %v347_v58, %v351_v43  ;;  %v3498_v11 = vcombine.low %v781_v53, %v784_v61  ;;  %v366_v5 = vsel %vm3478_vm5, %v361_v59, %v365_v55 }
  0x2c   : > { %v2873_v14 = vcombine.low %v342_v8, %v352_v9  ;;  %v371_v15 = vrot.slane %v370_v62, 4  ;;  %v384_v0 = vor.u32 %v383_v2, %v380_v60  ;;  %v387_v6 = vshll.u32 %v3427_v1, 16  ;;  %v3210_v1 = vld [vmem:[%s4827_s1] sm:$0xff]   ;;  %v286_v62 = vld [vmem:[%s3421_s11 + $0x38] sm:$0x1] }
  0x2d   : > { %1122 = vrot.lane.b32.xlu1 %v2890_v36, %s3319_s14  ;;  %v393_v16 = vrot.slane %v391_v3, 4  ;;  %v397_v17 = vshll.u32 %v280_v35, 16  ;;  %v402_v19 = vshrl.u32 %v3492_v7, 16  ;;  %v405_v20 = vshll.u32 %v3492_v7, 16  ;;  %3100 = vmatprep.subr.bf16.mxu0 %v3210_v1 }
  0x2e   : > { %1040 = vrot.lane.b32.xlu0 %v2873_v14, %s3320_s15  ;;  %v376_v22 = vsel %vm3478_vm5, %v371_v15, %v375_v63  ;;  %v385_v23 = vrot.slane %v384_v0, 4  ;;  %v389_v24 = vrot.slane %v387_v6, 5  ;;  %v415_v25 = vshrl.u32 %v3503_v12, 16  ;;  %3138 = vmatprep.subr.bf16.mxu1 %v3210_v1  ;;  %v3559_v15 = vld [vmem:[%s3421_s11 + $0x3c] sm:$0xf] }
  0x2f   : > { %v2874_v3 = vcombine.low %v366_v5, %v376_v22  ;;  %v404_v27 = vrot.slane %v402_v19, 4  ;;  %v399_v29 = vrot.slane %v397_v17, 5  ;;  %v407_v30 = vrot.slane %v405_v20, 5  ;;  %3101 = vmatpush3.bf16.msra.mxu0 %v3210_v1  ;;  %3141 = vmatpush3.bf16.msra.mxu1 %v3210_v1  ;;  %v288_v0 = vld [vmem:[%s3421_s11 + $0x40] sm:$0xf] }
  0x30   : > { %v394_v28 = vor.u32 %v393_v16, %v389_v24  ;;  %v411_v31 = vshll.u32 %v3503_v12, 16  ;;  %v417_v32 = vrot.slane %v415_v25, 4  ;;  %v421_v33 = vshll.u32 %v283_v26, 16  ;;  %3102 = vmatprep.subr.bf16.mxu0 %v3212_v34  ;;  %3139 = vmatprep.subr.bf16.mxu1 %v3212_v34 }
  0x31   : > { %1227 = vrot.lane.b32.xlu1 %v3498_v11, %s3318_s13  ;;  %v390_v35 = vsel %vm3478_vm5, %v385_v23, %v389_v24  ;;  %v408_v37 = vor.u32 %v407_v30, %v404_v27  ;;  %v3534_v45 = vcombine.low %v3492_v7, %v3503_v12  ;;  %v787_v46 = vrot.slane %v3503_v12, 5 }
  0x32   : > { %1042 = vrot.lane.b32.xlu0 %v2874_v3, %s3320_s15  ;;  %v395_v36 = vrot.slane %v394_v28, 4  ;;  %v413_v38 = vrot.slane %v411_v31, 5  ;;  %v423_v42 = vrot.slane %v421_v33, 5  ;;  %v2842_v53 = vrot.slane %v3492_v7, 9  ;;  %v289_v33 = vld [vmem:[%s3421_s11 + $0x44] sm:$0x1] }
  0x33   : > { %v409_v40 = vrot.slane %v408_v37, 4  ;;  %3103 = vmatpush3.bf16.msra.mxu0 %v3212_v34  ;;  %3142 = vmatpush3.bf16.msra.mxu1 %v3212_v34  ;;  %v789_v54 = vrot.slane %v787_v46, 4  ;;  %v790_v55 = vrot.slane %v283_v26, 5  ;;  %v426_v56 = vshrl.u32 %v284_v49, 16 }
  0x34   : > { %v400_v39 = vsel %vm3478_vm5, %v395_v36, %v399_v29  ;;  %v418_v41 = vor.u32 %v417_v32, %v413_v38  ;;  %v429_v57 = vshll.u32 %v284_v49, 16  ;;  %v439_v58 = vshrl.u32 %v285_v50, 16 }
  0x35   : > { %v2875_v43 = vcombine.low %v390_v35, %v400_v39  ;;  %v414_v47 = vsel %vm3478_vm5, %v409_v40, %v413_v38  ;;  %v435_v59 = vshll.u32 %v285_v50, 16  ;;  %v788_v60 = vsel %vm3443_vm4, %v2842_v53, %v787_v46 }
  0x36   : > { %1190 = vrot.lane.b32.xlu0 %v2874_v3, %s3321_s20  ;;  %v419_v44 = vrot.slane %v418_v41, 4  ;;  %v791_v61 = vsel %vm3443_vm4, %v789_v54, %v790_v55  ;;  %v428_v63 = vrot.slane %v426_v56, 4  ;;  %v431_v2 = vrot.slane %v429_v57, 5 }
  0x37   : > { %1192 = vrot.lane.b32.xlu1 %v2875_v43, %s3321_s20  ;;  %v437_v7 = vrot.slane %v435_v59, 5  ;;  %v441_v8 = vrot.slane %v439_v58, 4  ;;  %v2892_v9 = vcombine.low %v788_v60, %v791_v61  ;;  %v445_v5 = vshll.u32 %v286_v62, 16  ;;  %v3213_v60 = vld [vmem:[%s4827_s1 + $0x10] ss:$0 sps:$4 sm:$0x33]  }
  0x38   : > { %v424_v48 = vsel %vm3478_vm5, %v419_v44, %v423_v42  ;;  %v432_v12 = vor.u32 %v431_v2, %v428_v63  ;;  %v794_v16 = vrot.slane %v285_v50, 5  ;;  %v450_v17 = vshrl.u32 %v3559_v15, 16  ;;  %v292_v2 = vld [vmem:[%s3421_s11 + $0x50] sm:$0x1]  ;;  %3144 = vmatprep.subr.msk.bf16.mxu0 %vm1695_vm6, %v3213_v60  ;;  %3145 = vmatprep.subr.msk.bf16.mxu1 %vm1695_vm6, %v3213_v60 }
  0x39   : > { %v2876_v51 = vcombine.low %v414_v47, %v424_v48  ;;  %v442_v14 = vor.u32 %v441_v8, %v437_v7  ;;  %v447_v6 = vrot.slane %v445_v5, 5  ;;  %v453_v19 = vshll.u32 %v3559_v15, 16 }
  0x3a   : > { %1260 = vrot.lane.b32.xlu0 %v3433_v4, %s3322_s24  ;;  %v433_v20 = vrot.slane %v432_v12, 4  ;;  %v463_v23 = vshrl.u32 %v288_v0, 16  ;;  %v459_v24 = vshll.u32 %v288_v0, 16  ;;  %v3568_v25 = vcombine.low %v284_v49, %v285_v50  ;;  %v3601_v50 = vld [vmem:[%s3421_s11 + $0x4c] sm:$0xf] }
  0x3b   : > { %1262 = vrot.lane.b32.xlu1 %v3534_v45, %s3322_s24  ;;  %v443_v22 = vrot.slane %v442_v14, 4  ;;  %v2843_v26 = vrot.slane %v284_v49, 9  ;;  %v796_v1 = vrot.slane %v794_v16, 4  ;;  %v797_v3 = vrot.slane %v286_v62, 5  ;;  %v3598_v49 = vld [vmem:[%s3421_s11 + $0x48] sm:$0xf] }
  0x3c   : > { %v452_v27 = vrot.slane %v450_v17, 4  ;;  %v455_v28 = vrot.slane %v453_v19, 5  ;;  %v438_v29 = vsel %vm3478_vm5, %v433_v20, %v437_v7  ;;  %v461_v31 = vrot.slane %v459_v24, 5 }
  0x3d   : > { %v448_v30 = vsel %vm3478_vm5, %v443_v22, %v447_v6  ;;  %v465_v32 = vrot.slane %v463_v23, 4  ;;  %v795_v34 = vsel %vm3443_vm4, %v2843_v26, %v794_v16  ;;  %v798_v35 = vsel %vm3443_vm4, %v796_v1, %v797_v3  ;;  %v293_v6 = vld [vmem:[%s3421_s11 + $0x54] sm:$0xf]  ;;  %v294_v16 = vld [vmem:[%s3421_s11 + $0x58] sm:$0xf] }
  0x3e   : > { %1295 = vrot.lane.b32.xlu0 %v2875_v43, %s3323_s26  ;;  %v456_v36 = vor.u32 %v455_v28, %v452_v27  ;;  %v469_v38 = vshll.u32 %v289_v33, 16  ;;  %v2893_v39 = vcombine.low %v795_v34, %v798_v35  ;;  %v801_v44 = vrot.slane %v288_v0, 5  ;;  %v295_v35 = vld [vmem:[%s3421_s11 + $0x5c] sm:$0x1] }
  0x3f   : > { %1297 = vrot.lane.b32.xlu1 %v2876_v51, %s3323_s26  ;;  %v466_v37 = vor.u32 %v465_v32, %v461_v31  ;;  %v2857_v46 = vcombine.low %v3450_v18, %v3455_v21  ;;  %v804_v55 = vrot.slane %v289_v33, 5  ;;  %v474_v56 = vshrl.u32 %v3598_v49, 16 }
  0x40   : > { %v457_v40 = vrot.slane %v456_v36, 4  ;;  %v471_v42 = vrot.slane %v469_v38, 5  ;;  %v803_v54 = vrot.slane %v801_v44, 4  ;;  %v477_v57 = vshll.u32 %v3598_v49, 16 }
  0x41   : > { %v467_v41 = vrot.slane %v466_v37, 4  ;;  %v487_v58 = vshrl.u32 %v3601_v50, 16  ;;  %v483_v59 = vshll.u32 %v3601_v50, 16  ;;  %v476_v63 = vrot.slane %v474_v56, 4 }
  0x42   : > { %1330 = vrot.lane.b32.xlu0 %v3498_v11, %s3324_s27  ;;  %v462_v47 = vsel %vm3478_vm5, %v457_v40, %v461_v31  ;;  %v805_v62 = vsel %vm3443_vm4, %v803_v54, %v804_v55  ;;  %v479_v7 = vrot.slane %v477_v57, 5  ;;  %v1697_v12 = vsel %vm1695_vm6, %v3213_v60, 0  ;;  %v297_v55 = vld [vmem:[%s3421_s11 + $0x64] sm:$0xf] }
  0x43   : > { %1044 = vrot.lane.b32.xlu1 %v2875_v43, %s3320_s15  ;;  %v3589_v43 = vcombine.low %v3559_v15, %v288_v0  ;;  %v472_v48 = vsel %vm3478_vm5, %v467_v41, %v471_v42  ;;  %v485_v8 = vrot.slane %v483_v59, 5  ;;  %v493_v14 = vshll.u32 %v292_v2, 16  ;;  %3105 = vmatpush3.bf16.msra.mxu0 %v1697_v12 }
  0x44   : > { %v2878_v53 = vcombine.low %v462_v47, %v472_v48  ;;  %3143 = vmatpush3.bf16.msra.mxu1 %v1697_v12  ;;  %v808_v19 = vrot.slane %v3601_v50, 5  ;;  %v498_v20 = vshrl.u32 %v293_v6, 16  ;;  %v501_v22 = vshll.u32 %v293_v6, 16 }
  0x45   : > { %v495_v17 = vrot.slane %v493_v14, 5  ;;  %v511_v26 = vshrl.u32 %v294_v16, 16  ;;  %v507_v1 = vshll.u32 %v294_v16, 16  ;;  %v3632_v3 = vcombine.low %v3598_v49, %v3601_v50 }
  0x46   : > { %1332 = vrot.lane.b32.xlu0 %v2892_v9, %s3324_s27  ;;  %v2845_v27 = vrot.slane %v3598_v49, 9  ;;  %v810_v28 = vrot.slane %v808_v19, 4  ;;  %v503_v31 = vrot.slane %v501_v22, 5  ;;  %v517_v41 = vshll.u32 %v295_v35, 16 }
  0x47   : > { %1046 = vrot.lane.b32.xlu1 %v2876_v51, %s3320_s15  ;;  %v513_v34 = vrot.slane %v511_v26, 4  ;;  %v3653_v49 = vcombine.low %v293_v6, %v294_v16  ;;  %v815_v50 = vrot.slane %v294_v16, 5  ;;  %v2846_v56 = vrot.slane %v293_v6, 9 }
  0x48   : > { %v809_v37 = vsel %vm3443_vm4, %v2845_v27, %v808_v19  ;;  %v519_v48 = vrot.slane %v517_v41, 5  ;;  %v818_v57 = vrot.slane %v295_v35, 5  ;;  %v3678_v19 = vld [vmem:[%s3421_s11 + $0x70] sm:$0xf]  ;;  %vm2130_vm6 = vsmask.f32 4368 }
  0x49   : > { %v817_v59 = vrot.slane %v815_v50, 4  ;;  %v559_v27 = vshrl.u32 %v3678_v19, 16 }
  0x4a   : > { %1124 = vrot.lane.b32.xlu0 %v3498_v11, %s3319_s14  ;;  %v2877_v11 = vcombine.low %v438_v29, %v448_v30  ;;  %v811_v29 = vrot.slane %v292_v2, 5  ;;  %v500_v30 = vrot.slane %v498_v20, 4  ;;  %v816_v2 = vsel %vm3443_vm4, %v2846_v56, %v815_v50 }
  0x4b   : > { %1126 = vrot.lane.b32.xlu1 %v2892_v9, %s3319_s14 }
  0x4c   : > { %v812_v38 = vsel %vm3443_vm4, %v810_v28, %v811_v29  ;;  %v555_v28 = vshll.u32 %v3678_v19, 16 }
  0x4d   : > { %v2895_v42 = vcombine.low %v809_v37, %v812_v38  ;;  %v561_v37 = vrot.slane %v559_v27, 4  ;;  %v301_v38 = vld [vmem:[%s3421_s11 + $0x74] sm:$0x1] }
  0x4e   : > { %1159 = vrot.lane.b32.xlu0 %v3534_v45, %s3317_s12 }
  0x4f   : > { %1161 = vrot.lane.b32.xlu1 %v3568_v25, %s3317_s12 }
  0x52   : > { %1194 = vrot.lane.b32.xlu0 %v2876_v51, %s3321_s20  ;;  %v2844_v51 = vrot.slane %v3559_v15, 9  ;;  %v480_v15 = vor.u32 %v479_v7, %v476_v63  ;;  %v531_v63 = vshll.u32 %v297_v55, 16  ;;  %v819_v7 = vsel %vm3443_vm4, %v817_v59, %v818_v57 }
  0x53   : > { %1196 = vrot.lane.b32.xlu1 %v2877_v11, %s3321_s20  ;;  %v829_v57 = vrot.slane %v3678_v19, 5 }
  0x54   : > { %v802_v61 = vsel %vm3443_vm4, %v2844_v51, %v801_v44  ;;  %v481_v23 = vrot.slane %v480_v15, 4  ;;  %v533_v12 = vrot.slane %v531_v63, 5  ;;  %v2896_v15 = vcombine.low %v816_v2, %v819_v7 }
  0x55   : > { %v2894_v5 = vcombine.low %v802_v61, %v805_v62  ;;  %v535_v62 = vshrl.u32 %v297_v55, 16  ;;  %v832_v2 = vrot.slane %v301_v38, 5 }
  0x56   : > { %1229 = vrot.lane.b32.xlu0 %v2892_v9, %s3318_s13  ;;  %v489_v9 = vrot.slane %v487_v58, 4  ;;  %v486_v32 = vsel %vm3478_vm5, %v481_v23, %v485_v8  ;;  %v822_v23 = vrot.slane %v297_v55, 5 }
  0x57   : > { %1231 = vrot.lane.b32.xlu1 %v2893_v39, %s3318_s13  ;;  %v537_v14 = vrot.slane %v535_v62, 4 }
  0x58   : > { %v490_v0 = vor.u32 %v489_v9, %v485_v8 }
  0x59   : > { %v538_v16 = vor.u32 %v537_v14, %v533_v12 }
  0x5a   : > { %1264 = vrot.lane.b32.xlu0 %v3568_v25, %s3322_s24  ;;  %v491_v24 = vrot.slane %v490_v0, 4 }
  0x5b   : > { %1266 = vrot.lane.b32.xlu1 %v3589_v43, %s3322_s24  ;;  %v539_v26 = vrot.slane %v538_v16, 4 }
  0x5c   : > { %v496_v33 = vsel %vm3478_vm5, %v491_v24, %v495_v17  ;;  %v3675_v17 = vld [vmem:[%s3421_s11 + $0x6c] sm:$0xf] }
  0x5d   : > { %v2879_v36 = vcombine.low %v486_v32, %v496_v33  ;;  %v546_v24 = vshrl.u32 %v3675_v17, 16  ;;  %v824_v32 = vrot.slane %v822_v23, 4  ;;  %v3716_v56 = vcombine.low %v3675_v17, %v3678_v19 }
  0x5e   : > { %1299 = vrot.lane.b32.xlu0 %v2877_v11, %s3323_s26  ;;  %v2848_v63 = vrot.slane %v3675_v17, 9 }
  0x5f   : > { %1301 = vrot.lane.b32.xlu1 %v2878_v53, %s3323_s26 }
  0x62   : > { %1334 = vrot.lane.b32.xlu0 %v2893_v39, %s3324_s27 }
  0x63   : > { %1048 = vrot.lane.b32.xlu1 %v2877_v11, %s3320_s15  ;;  %v509_v11 = vrot.slane %v507_v1, 5  ;;  %v549_v1 = vshll.u32 %v3675_v17, 16 }
  0x65   : > { %v514_v40 = vor.u32 %v513_v34, %v509_v11  ;;  %v551_v35 = vrot.slane %v549_v1, 5 }
  0x66   : > { %1336 = vrot.lane.b32.xlu0 %v2894_v5, %s3324_s27 }
  0x67   : > { %1050 = vrot.lane.b32.xlu1 %v2878_v53, %s3320_s15  ;;  %v515_v47 = vrot.slane %v514_v40, 4 }
  0x69   : > { %v520_v54 = vsel %vm3478_vm5, %v515_v47, %v519_v48  ;;  %v565_v47 = vshll.u32 %v301_v38, 16 }
  0x6a   : > { %1128 = vrot.lane.b32.xlu0 %v2893_v39, %s3319_s14  ;;  %v504_v39 = vor.u32 %v503_v31, %v500_v30 }
  0x6b   : > { %1130 = vrot.lane.b32.xlu1 %v2894_v5, %s3319_s14 }
  0x6c   : > { %v505_v44 = vrot.slane %v504_v39, 4 }
  0x6e   : > { %1163 = vrot.lane.b32.xlu0 %v3589_v43, %s3317_s12  ;;  %v510_v51 = vsel %vm3478_vm5, %v505_v44, %v509_v11  ;;  %v548_v11 = vrot.slane %v546_v24, 4 }
  0x6f   : > { %1165 = vrot.lane.b32.xlu1 %v3632_v3, %s3317_s12  ;;  %v2880_v58 = vcombine.low %v510_v51, %v520_v54 }
  0x72   : > { %1198 = vrot.lane.b32.xlu0 %v2878_v53, %s3321_s20  ;;  %v296_v53 = vld [vmem:[%s3421_s11 + $0x60] sm:$0xf] }
  0x73   : > { %1200 = vrot.lane.b32.xlu1 %v2879_v36, %s3321_s20  ;;  %v522_v60 = vshrl.u32 %v296_v53, 16  ;;  %v525_v61 = vshll.u32 %v296_v53, 16  ;;  %v3687_v29 = vcombine.low %v296_v53, %v297_v55  ;;  %v2847_v30 = vrot.slane %v296_v53, 9 }
  0x74   : > { %v567_v53 = vrot.slane %v565_v47, 5 }
  0x75   : > { %v524_v8 = vrot.slane %v522_v60, 4  ;;  %v527_v9 = vrot.slane %v525_v61, 5  ;;  %v823_v40 = vsel %vm3443_vm4, %v2847_v30, %v822_v23  ;;  %v3724_v60 = vld [vmem:[%s3421_s11 + $0x78] sm:$0xf]  ;;  %v3727_v61 = vld [vmem:[%s3421_s11 + $0x7c] sm:$0xf] }
  0x76   : > { %1233 = vrot.lane.b32.xlu0 %v2894_v5, %s3318_s13  ;;  %v298_v5 = vld [vmem:[%s3421_s11 + $0x68] sm:$0x1]  ;;  %v583_v14 = vshrl.u32 %v3727_v61, 16  ;;  %v3782_v18 = vcombine.low %v3724_v60, %v3727_v61  ;;  %v2849_v21 = vrot.slane %v3724_v60, 9 }
  0x77   : > { %1235 = vrot.lane.b32.xlu1 %v2895_v42, %s3318_s13  ;;  %v528_v0 = vor.u32 %v527_v9, %v524_v8  ;;  %v541_v6 = vshll.u32 %v298_v5, 16  ;;  %v825_v33 = vrot.slane %v298_v5, 5  ;;  %v831_v9 = vrot.slane %v829_v57, 4 }
  0x78   : > { %v570_v5 = vshrl.u32 %v3724_v60, 16  ;;  %v585_v24 = vrot.slane %v583_v14, 4 }
  0x79   : > { %v529_v20 = vrot.slane %v528_v0, 4  ;;  %v543_v22 = vrot.slane %v541_v6, 5  ;;  %v826_v41 = vsel %vm3443_vm4, %v824_v32, %v825_v33  ;;  %v830_v6 = vsel %vm3443_vm4, %v2848_v63, %v829_v57  ;;  %v3758_v32 = vld [vmem:[%s3421_s11 + $0x84] sm:$0xf]  ;;  %v3761_v33 = vld [vmem:[%s3421_s11 + $0x88] sm:$0xf] }
  0x7a   : > { %1268 = vrot.lane.b32.xlu0 %v3632_v3, %s3322_s24  ;;  %v3705_v48 = vcombine.low %v823_v40, %v826_v41  ;;  %v833_v16 = vsel %vm3443_vm4, %v831_v9, %v832_v2  ;;  %v572_v17 = vrot.slane %v570_v5, 4  ;;  %v607_v41 = vshrl.u32 %v3761_v33, 16  ;;  %v3794_v2 = vld [vmem:[%s3421_s11 + $0x8c] sm:$0x1] }
  0x7b   : > { %1270 = vrot.lane.b32.xlu1 %v3653_v49, %s3322_s24  ;;  %v534_v31 = vsel %vm3478_vm5, %v529_v20, %v533_v12  ;;  %v544_v34 = vsel %vm3478_vm5, %v539_v26, %v543_v22  ;;  %v573_v12 = vshll.u32 %v3724_v60, 16  ;;  %v304_v22 = vld [vmem:[%s3421_s11 + $0x80] sm:$0x1]  ;;  %v3752_v26 = vcombine.low %v830_v6, %v833_v16 }
  0x7c   : > { %v2881_v39 = vcombine.low %v534_v31, %v544_v34  ;;  %v613_v16 = vshll.u32 %v3794_v2, 16 }
  0x7d   : > { %v575_v19 = vrot.slane %v573_v12, 5 }
  0x7e   : > { %1303 = vrot.lane.b32.xlu0 %v2879_v36, %s3323_s26 }
  0x7f   : > { %1305 = vrot.lane.b32.xlu1 %v2880_v58, %s3323_s26  ;;  %v576_v27 = vor.u32 %v575_v19, %v572_v17 }
  0x81   : > { %v577_v34 = vrot.slane %v576_v27, 4 }
  0x82   : > { %1338 = vrot.lane.b32.xlu0 %v2895_v42, %s3324_s27 }
  0x83   : > { %1052 = vrot.lane.b32.xlu1 %v2879_v36, %s3320_s15  ;;  %v557_v36 = vrot.slane %v555_v28, 5  ;;  %v589_v28 = vshll.u32 %v304_v22, 16 }
  0x85   : > { %v562_v44 = vor.u32 %v561_v37, %v557_v36  ;;  %v597_v37 = vshll.u32 %v3758_v32, 16 }
  0x86   : > { %1340 = vrot.lane.b32.xlu0 %v2896_v15, %s3324_s27 }
  0x87   : > { %1054 = vrot.lane.b32.xlu1 %v2880_v58, %s3320_s15  ;;  %v563_v54 = vrot.slane %v562_v44, 4 }
  0x89   : > { %v568_v59 = vsel %vm3478_vm5, %v563_v54, %v567_v53 }
  0x8a   : > { %1132 = vrot.lane.b32.xlu0 %v2895_v42, %s3319_s14  ;;  %v552_v42 = vor.u32 %v551_v35, %v548_v11  ;;  %v836_v11 = vrot.slane %v3727_v61, 5  ;;  %v591_v35 = vrot.slane %v589_v28, 5  ;;  %v615_v28 = vrot.slane %v613_v16, 5 }
  0x8b   : > { %1134 = vrot.lane.b32.xlu1 %v2896_v15, %s3319_s14 }
  0x8c   : > { %v553_v51 = vrot.slane %v552_v42, 4  ;;  %v603_v42 = vshll.u32 %v3761_v33, 16  ;;  %v837_v12 = vsel %vm3443_vm4, %v2849_v21, %v836_v11 }
  0x8e   : > { %1167 = vrot.lane.b32.xlu0 %v3653_v49, %s3317_s12 }
  0x8f   : > { %1169 = vrot.lane.b32.xlu1 %v3687_v29, %s3317_s12 }
  0x91   : > { %v3709_v55 = vpop.permute.xlu1 %1157 }
  0x92   : > { %1202 = vrot.lane.b32.xlu0 %v2880_v58, %s3321_s20  ;;  %v3707_v50 = vpop.permute.xlu0 %1155  ;;  %v558_v58 = vsel %vm3478_vm5, %v553_v51, %v557_v36  ;;  %v594_v36 = vshrl.u32 %v3758_v32, 16 }
  0x93   : > { %1204 = vrot.lane.b32.xlu1 %v2881_v39, %s3321_s20  ;;  %v3736_v8 = vcombine.low %v558_v58, %v568_v59  ;;  %v599_v58 = vrot.slane %v597_v37, 5  ;;  %v605_v59 = vrot.slane %v603_v42, 5  ;;  %v846_v42 = vrot.slane %v3794_v2, 5 }
  0x94   : > { %v596_v53 = vrot.slane %v594_v36, 4 }
  0x96   : > { %1237 = vrot.lane.b32.xlu0 %v2896_v15, %s3318_s13  ;;  %v579_v15 = vshll.u32 %v3727_v61, 16  ;;  %v609_v61 = vrot.slane %v607_v41, 4  ;;  %v3851_v41 = vld [vmem:[%s3421_s11 + $0x94] sm:$0xf] }
  0x97   : > { %1239 = vrot.lane.b32.xlu1 %v3705_v48, %s3318_s13 }
  0x98   : > { %v3731_v62 = vpop.permute.xlu0 %1225  ;;  %v581_v23 = vrot.slane %v579_v15, 5  ;;  %v610_v6 = vor.u32 %v609_v61, %v605_v59  ;;  %v310_v61 = vld [vmem:[%s3421_s11 + $0x98] sm:$0x1] }
  0x9a   : > { %1272 = vrot.lane.b32.xlu0 %v3687_v29, %s3322_s24  ;;  %v586_v31 = vor.u32 %v585_v24, %v581_v23  ;;  %v582_v54 = vsel %vm3478_vm5, %v577_v34, %v581_v23  ;;  %v3836_v34 = vcombine.low %v3758_v32, %v3761_v33 }
  0x9b   : > { %1274 = vrot.lane.b32.xlu1 %v3716_v56, %s3322_s24  ;;  %v1121_v7 = vpop.permute.xlu1 %1120 }
  0x9c   : > { %v587_v40 = vrot.slane %v586_v31, 4 }
  0x9e   : > { %1307 = vrot.lane.b32.xlu0 %v2881_v39, %s3323_s26 }
  0x9f   : > { %1309 = vrot.lane.b32.xlu1 %v3736_v8, %s3323_s26  ;;  %v1123_v0 = vpop.permute.xlu1 %1122 }
  0xa0   : > { %v1041_v20 = vpop.permute.xlu0 %1040 }
  0xa1   : > { %v1365_v38 = vsel %vm1362_vm7, %v2857_v46, %v1041_v20  ;;  %v839_v46 = vrot.slane %v304_v22, 5 }
  0xa2   : > { %1342 = vrot.lane.b32.xlu0 %v3705_v48, %s3324_s27  ;;  %v1413_v51 = vsel %vm1411_vm8, %v1365_v38, %v1121_v7  ;;  %v3845_v38 = vld [vmem:[%s3421_s11 + $0x90] sm:$0xf] }
  0xa3   : > { %1056 = vrot.lane.b32.xlu1 %v2881_v39, %s3320_s15  ;;  %v3755_v1 = vpop.permute.xlu1 %1227  ;;  %v1446_v7 = vsel %vm1444_vm9, %v1413_v51, %v3707_v50  ;;  %v618_v21 = vshrl.u32 %v3845_v38, 16 }
  0xa4   : > { %v1043_v30 = vpop.permute.xlu0 %1042 }
  0xa5   : > { %v1368_v47 = vsel %vm1362_vm7, %v3438_v10, %v1043_v30  ;;  %v838_v10 = vrot.slane %v836_v11, 4 }
  0xa6   : > { %1344 = vrot.lane.b32.xlu0 %v3752_v26, %s3324_s27  ;;  %v1415_v60 = vsel %vm1411_vm8, %v1368_v47, %v1123_v0  ;;  %v600_v0 = vor.u32 %v599_v58, %v596_v53 }
  0xa7   : > { %1058 = vrot.lane.b32.xlu1 %v3736_v8, %s3320_s15  ;;  %v840_v14 = vsel %vm3443_vm4, %v838_v10, %v839_v46  ;;  %v1448_v50 = vsel %vm1444_vm9, %v1415_v60, %v3709_v55  ;;  %v621_v46 = vshll.u32 %v3845_v38, 16  ;;  %v627_v10 = vshll.u32 %v3851_v41, 16 }
  0xa8   : > { %v1191_v39 = vpop.permute.xlu0 %1190  ;;  %v3820_v55 = vcombine.low %v837_v12, %v840_v14  ;;  %v601_v27 = vrot.slane %v600_v0, 4  ;;  %v637_v12 = vshll.u32 %v310_v61, 16 }
  0xa9   : > { %v1193_v44 = vpop.permute.xlu1 %1192  ;;  %v1479_v9 = vsel %vm1477_vm10, %v1446_v7, %v1191_v39  ;;  %v623_v58 = vrot.slane %v621_v46, 5  ;;  %v629_v60 = vrot.slane %v627_v10, 5 }
  0xaa   : > { %1136 = vrot.lane.b32.xlu0 %v3705_v48, %s3319_s14  ;;  %v592_v48 = vsel %vm3478_vm5, %v587_v40, %v591_v35  ;;  %v1512_v19 = vsel %vm1510_vm11, %v1479_v9, %v3731_v62  ;;  %v1481_v20 = vsel %vm1477_vm10, %v1448_v50, %v1193_v44  ;;  %v611_v62 = vrot.slane %v610_v6, 4  ;;  %v3887_v6 = vld [vmem:[%s3421_s11 + $0xa0] sm:$0xf] }
  0xab   : > { %1138 = vrot.lane.b32.xlu1 %v3752_v26, %s3319_s14  ;;  %v3803_v5 = vcombine.low %v582_v54, %v592_v48  ;;  %v1514_v31 = vsel %vm1510_vm11, %v1481_v20, %v3755_v1  ;;  %v843_v35 = vrot.slane %v3761_v33, 5  ;;  %v606_v1 = vsel %vm3478_vm5, %v601_v27, %v605_v59 }
  0xac   : > { %v1261_v57 = vpop.permute.xlu0 %1260  ;;  %v2850_v33 = vrot.slane %v3758_v32, 9  ;;  %v631_v54 = vshrl.u32 %v3851_v41, 16  ;;  %v620_v48 = vrot.slane %v618_v21, 4  ;;  %v651_v27 = vshll.u32 %v3887_v6, 16 }
  0xad   : > { %v1263_v63 = vpop.permute.xlu1 %1262  ;;  %v1545_v22 = vsel %vm1543_vm12, %v1512_v19, %v1261_v57  ;;  %v845_v47 = vrot.slane %v843_v35, 4  ;;  %v850_v19 = vrot.slane %v3851_v41, 5 }
  0xae   : > { %1171 = vrot.lane.b32.xlu0 %v3716_v56, %s3317_s12  ;;  %v1547_v11 = vsel %vm1543_vm12, %v1514_v31, %v1263_v63  ;;  %v844_v32 = vsel %vm3443_vm4, %v2850_v33, %v843_v35  ;;  %v633_v63 = vrot.slane %v631_v54, 4  ;;  %v624_v9 = vor.u32 %v623_v58, %v620_v48 }
  0xaf   : > { %1173 = vrot.lane.b32.xlu1 %v3782_v18, %s3317_s12  ;;  %v847_v57 = vsel %vm3443_vm4, %v845_v47, %v846_v42  ;;  %v853_v35 = vrot.slane %v310_v61, 5 }
  0xb0   : > { %v1296_v15 = vpop.permute.xlu0 %1295  ;;  %v3879_v7 = vcombine.low %v844_v32, %v847_v57  ;;  %v634_v50 = vor.u32 %v633_v63, %v629_v60  ;;  %v625_v16 = vrot.slane %v624_v9, 4 }
  0xb1   : > { %v1298_v17 = vpop.permute.xlu1 %1297  ;;  %v1578_v23 = vsel %vm1576_vm13, %v1545_v22, %v1296_v15  ;;  %v3884_v15 = vld [vmem:[%s3421_s11 + $0x9c] sm:$0xf] }
  0xb2   : > { %1206 = vrot.lane.b32.xlu0 %v3736_v8, %s3321_s20  ;;  %v1580_v36 = vsel %vm1576_vm13, %v1547_v11, %v1298_v17  ;;  %v639_v17 = vrot.slane %v637_v12, 5  ;;  %v635_v22 = vrot.slane %v634_v50, 4  ;;  %v630_v31 = vsel %vm3478_vm5, %v625_v16, %v629_v60 }
  0xb3   : > { %1208 = vrot.lane.b32.xlu1 %v3803_v5, %s3321_s20  ;;  %v852_v11 = vrot.slane %v850_v19, 4 }
  0xb4   : > { %v1331_v24 = vpop.permute.xlu0 %1330 }
  0xb5   : > { %v3823_v30 = vpop.permute.xlu1 %1044  ;;  %v1611_v8 = vsel %vm1609_vm14, %v1578_v23, %v1331_v24  ;;  %v645_v23 = vshll.u32 %v3884_v15, 16  ;;  %v655_v24 = vshrl.u32 %v3887_v6, 16 }
  0xb6   : > { %1241 = vrot.lane.b32.xlu0 %v3752_v26, %s3318_s13  ;;  %3106 = vmatprep.mubr.msk.bf16.mxu0 %vm1662_vm15, %v1611_v8  ;;  %v616_v26 = vsel %vm3478_vm5, %v611_v62, %v615_v28  ;;  %v3902_v28 = vcombine.low %v3845_v38, %v3851_v41  ;;  %v2851_v8 = vrot.slane %v3845_v38, 9  ;;  %v1371_v38 = vsel %vm1362_vm7, %v3433_v4, %v3823_v30 }
  0xb7   : > { %1243 = vrot.lane.b32.xlu1 %v3820_v55, %s3318_s13  ;;  %v3860_v44 = vcombine.low %v606_v1, %v616_v26  ;;  %v640_v1 = vsel %vm3478_vm5, %v635_v22, %v639_v17  ;;  %v647_v26 = vrot.slane %v645_v23, 5  ;;  %v657_v41 = vrot.slane %v655_v24, 4  ;;  %v3968_v22 = vld [vmem:[%s3421_s11 + $0xa8] sm:$0xf] }
  0xb8   : > { %v1333_v37 = vpop.permute.xlu0 %1332  ;;  %v3922_v47 = vcombine.low %v630_v31, %v640_v1  ;;  %v851_v21 = vsel %vm3443_vm4, %v2851_v8, %v850_v19  ;;  %v854_v4 = vsel %vm3443_vm4, %v852_v11, %v853_v35  ;;  %v857_v17 = vrot.slane %v3887_v6, 5 }
  0xb9   : > { %v3847_v39 = vpop.permute.xlu1 %1046  ;;  %v1613_v40 = vsel %vm1609_vm14, %v1580_v36, %v1333_v37  ;;  %v3942_v60 = vcombine.low %v851_v21, %v854_v4  ;;  %v666_v11 = vshrl.u32 %v3968_v22, 16  ;;  %v669_v35 = vshll.u32 %v3968_v22, 16 }
  0xba   : > { %1276 = vrot.lane.b32.xlu0 %v3782_v18, %s3322_s24  ;;  %3107 = vmatmul.mubr.msk.bf16.vlgmr.msra.gmra.mrb[0].mxu0 %vm1662_vm15, %v1613_v40  ;;  %v653_v40 = vrot.slane %v651_v27, 5  ;;  %v1374_v48 = vsel %vm1362_vm7, %v3534_v45, %v3847_v39  ;;  %v3974_v27 = vld [vmem:[%s3421_s11 + $0xac] sm:$0xf]  ;;  %v859_v31 = vrot.slane %v857_v17, 4 }
  0xbb   : > { %1278 = vrot.lane.b32.xlu1 %v3836_v34, %s3322_s24  ;;  %v675_v1 = vshll.u32 %v3974_v27, 16 }
  0xbc   : > { %v1125_v51 = vpop.permute.xlu0 %1124  ;;  %v658_v32 = vor.u32 %v657_v41, %v653_v40  ;;  %v671_v41 = vrot.slane %v669_v35, 5 }
  0xbd   : > { %v3866_v53 = vpop.permute.xlu1 %1126  ;;  %v1417_v42 = vsel %vm1411_vm8, %v1371_v38, %v1125_v51  ;;  %v316_v38 = vld [vmem:[%s3421_s11 + $0xb0] sm:$0x1] }
  0xbe   : > { %1311 = vrot.lane.b32.xlu0 %v3803_v5, %s3323_s26  ;;  %v685_v4 = vshll.u32 %v316_v38, 16 }
  0xbf   : > { %1313 = vrot.lane.b32.xlu1 %v3860_v44, %s3323_s26 }
  0xc0   : > { %v1160_v59 = vpop.permute.xlu0 %1159 }
  0xc1   : > { %v1162_v2 = vpop.permute.xlu1 %1161  ;;  %v1450_v54 = vsel %vm1444_vm9, %v1417_v42, %v1160_v59  ;;  %v1419_v59 = vsel %vm1411_vm8, %v1374_v48, %v3866_v53  ;;  %v677_v42 = vrot.slane %v675_v1, 5  ;;  %v4010_v48 = vld [vmem:[%s3421_s11 + $0xb8] sm:$0xf] }
  0xc2   : > { %1346 = vrot.lane.b32.xlu0 %v3820_v55, %s3324_s27  ;;  %v1452_v9 = vsel %vm1444_vm9, %v1419_v59, %v1162_v2  ;;  %v687_v59 = vrot.slane %v685_v4, 5 }
  0xc3   : > { %1060 = vrot.lane.b32.xlu1 %v3803_v5, %s3320_s15  ;;  %v642_v5 = vshrl.u32 %v3884_v15, 16 }
  0xc4   : > { %v1195_v14 = vpop.permute.xlu0 %1194 }
  0xc5   : > { %v1197_v0 = vpop.permute.xlu1 %1196  ;;  %v644_v36 = vrot.slane %v642_v5, 4  ;;  %v1483_v51 = vsel %vm1477_vm10, %v1450_v54, %v1195_v14  ;;  %v659_v14 = vrot.slane %v658_v32, 4 }
  0xc6   : > { %1348 = vrot.lane.b32.xlu0 %v3879_v7, %s3324_s27 }
  0xc7   : > { %1062 = vrot.lane.b32.xlu1 %v3860_v44, %s3320_s15  ;;  %v648_v30 = vor.u32 %v647_v26, %v644_v36 }
  0xc8   : > { %v1230_v20 = vpop.permute.xlu0 %1229 }
  0xc9   : > { %v1232_v62 = vpop.permute.xlu1 %1231  ;;  %v1516_v58 = vsel %vm1510_vm11, %v1483_v51, %v1230_v20  ;;  %v649_v12 = vrot.slane %v648_v30, 4  ;;  %v4007_v51 = vld [vmem:[%s3421_s11 + $0xb4] sm:$0xf] }
  0xca   : > { %1140 = vrot.lane.b32.xlu0 %v3820_v55, %s3319_s14  ;;  %v3912_v55 = vld [vmem:[%s3421_s11 + $0xa4] sm:$0x1] }
  0xcb   : > { %1142 = vrot.lane.b32.xlu1 %v3879_v7, %s3319_s14  ;;  %v661_v46 = vshll.u32 %v3912_v55, 16  ;;  %v654_v20 = vsel %vm3478_vm5, %v649_v12, %v653_v40  ;;  %v668_v40 = vrot.slane %v666_v11, 4  ;;  %v699_v12 = vshll.u32 %v4010_v48, 16 }
  0xcc   : > { %v1265_v37 = vpop.permute.xlu0 %1264 }
  0xcd   : > { %v1267_v33 = vpop.permute.xlu1 %1266  ;;  %v1549_v61 = vsel %vm1543_vm12, %v1516_v58, %v1265_v37  ;;  %v663_v63 = vrot.slane %v661_v46, 5  ;;  %v679_v37 = vshrl.u32 %v3974_v27, 16 }
  0xce   : > { %1175 = vrot.lane.b32.xlu0 %v3836_v34, %s3317_s12 }
  0xcf   : > { %1177 = vrot.lane.b32.xlu1 %v3902_v28, %s3317_s12  ;;  %v681_v21 = vrot.slane %v679_v37, 4 }
  0xd0   : > { %v1300_v10 = vpop.permute.xlu0 %1299 }
  0xd1   : > { %v1302_v57 = vpop.permute.xlu1 %1301  ;;  %v1582_v45 = vsel %vm1576_vm13, %v1549_v61, %v1300_v10  ;;  %v672_v10 = vor.u32 %v671_v41, %v668_v40  ;;  %v682_v32 = vor.u32 %v681_v21, %v677_v42  ;;  %v864_v61 = vrot.slane %v3974_v27, 5 }
  0xd2   : > { %1210 = vrot.lane.b32.xlu0 %v3860_v44, %s3321_s20  ;;  %v1485_v44 = vsel %vm1477_vm10, %v1452_v9, %v1197_v0  ;;  %v3959_v0 = vcombine.low %v3884_v15, %v3887_v6  ;;  %v2852_v6 = vrot.slane %v3884_v15, 9 }
  0xd3   : > { %1212 = vrot.lane.b32.xlu1 %v3922_v47, %s3321_s20  ;;  %v1518_v16 = vsel %vm1510_vm11, %v1485_v44, %v1232_v62  ;;  %v860_v62 = vrot.slane %v3912_v55, 5  ;;  %v673_v58 = vrot.slane %v672_v10, 4  ;;  %v683_v9 = vrot.slane %v682_v32, 4 }
  0xd4   : > { %v1335_v39 = vpop.permute.xlu0 %1334  ;;  %v1551_v2 = vsel %vm1543_vm12, %v1518_v16, %v1267_v33  ;;  %v858_v15 = vsel %vm3443_vm4, %v2852_v6, %v857_v17  ;;  %v4025_v44 = vcombine.low %v3968_v22, %v3974_v27  ;;  %v867_v17 = vrot.slane %v316_v38, 5 }
  0xd5   : > { %v3947_v50 = vpop.permute.xlu1 %1048  ;;  %v1615_v53 = vsel %vm1609_vm14, %v1582_v45, %v1335_v39  ;;  %v1584_v19 = vsel %vm1576_vm13, %v1551_v2, %v1302_v57  ;;  %v861_v55 = vsel %vm3443_vm4, %v859_v31, %v860_v62  ;;  %v693_v45 = vshll.u32 %v4007_v51, 16 }
  0xd6   : > { %1245 = vrot.lane.b32.xlu0 %v3879_v7, %s3318_s13  ;;  %3110 = vmatprep.mubr.msk.bf16.mxu0 %vm1662_vm15, %v1615_v53  ;;  %v664_v7 = vsel %vm3478_vm5, %v659_v14, %v663_v63  ;;  %v4002_v54 = vcombine.low %v858_v15, %v861_v55  ;;  %v703_v39 = vshrl.u32 %v4010_v48, 16  ;;  %v2853_v53 = vrot.slane %v3968_v22, 9 }
  0xd7   : > { %1247 = vrot.lane.b32.xlu1 %v3942_v60, %s3318_s13  ;;  %v3983_v8 = vcombine.low %v654_v20, %v664_v7  ;;  %v678_v16 = vsel %vm3478_vm5, %v673_v58, %v677_v42  ;;  %v866_v2 = vrot.slane %v864_v61, 4  ;;  %v688_v20 = vsel %vm3478_vm5, %v683_v9, %v687_v59 }
  0xd8   : > { %v1337_v5 = vpop.permute.xlu0 %1336  ;;  %v695_v7 = vrot.slane %v693_v45, 5  ;;  %v705_v27 = vrot.slane %v703_v39, 4  ;;  %v1377_v22 = vsel %vm1362_vm7, %v3568_v25, %v3947_v50  ;;  %v4045_v31 = vcombine.low %v678_v16, %v688_v20 }
  0xd9   : > { %v3970_v23 = vpop.permute.xlu1 %1050  ;;  %v1617_v24 = vsel %vm1609_vm14, %v1584_v19, %v1337_v5  ;;  %v865_v11 = vsel %vm3443_vm4, %v2853_v53, %v864_v61  ;;  %v868_v25 = vsel %vm3443_vm4, %v866_v2, %v867_v17  ;;  %v871_v61 = vrot.slane %v4010_v48, 5 }
  0xda   : > { %1280 = vrot.lane.b32.xlu0 %v3902_v28, %s3322_s24  ;;  %3111 = vmatmul.mubr.msk.bf16.gmra.mrb[4].mxu0 %vm1662_vm15, %v1617_v24  ;;  %v701_v24 = vrot.slane %v699_v12, 5  ;;  %v1380_v40 = vsel %vm1362_vm7, %v3589_v43, %v3970_v23  ;;  %v4065_v42 = vcombine.low %v865_v11, %v868_v25  ;;  %v2854_v17 = vrot.slane %v4007_v51, 9 }
  0xdb   : > { %1282 = vrot.lane.b32.xlu1 %v3959_v0, %s3322_s24 }
  0xdc   : > { %v1129_v36 = vpop.permute.xlu0 %1128  ;;  %v706_v15 = vor.u32 %v705_v27, %v701_v24 }
  0xdd   : > { %v3989_v26 = vpop.permute.xlu1 %1130  ;;  %v1421_v62 = vsel %vm1411_vm8, %v1377_v22, %v1129_v36 }
  0xde   : > { %1315 = vrot.lane.b32.xlu0 %v3922_v47, %s3323_s26 }
  0xdf   : > { %1317 = vrot.lane.b32.xlu1 %v3983_v8, %s3323_s26 }
  0xe0   : > { %v1164_v33 = vpop.permute.xlu0 %1163 }
  0xe1   : > { %v1166_v46 = vpop.permute.xlu1 %1165  ;;  %v1454_v37 = vsel %vm1444_vm9, %v1421_v62, %v1164_v33  ;;  %v1423_v33 = vsel %vm1411_vm8, %v1380_v40, %v3989_v26  ;;  %v322_v62 = vld [vmem:[%s3421_s11 + $0xc8] sm:$0x1] }
  0xe2   : > { %1350 = vrot.lane.b32.xlu0 %v3942_v60, %s3324_s27  ;;  %v1456_v10 = vsel %vm1444_vm9, %v1423_v33, %v1166_v46  ;;  %v4078_v46 = vld [vmem:[%s3421_s11 + $0xc0] sm:$0xf] }
  0xe3   : > { %1064 = vrot.lane.b32.xlu1 %v3922_v47, %s3320_s15  ;;  %v690_v47 = vshrl.u32 %v4007_v51, 16  ;;  %v880_v53 = vshll.u32 %v4078_v46, 16 }
  0xe4   : > { %v1199_v30 = vpop.permute.xlu0 %1198 }
  0xe5   : > { %v1201_v57 = vpop.permute.xlu1 %1200  ;;  %v692_v19 = vrot.slane %v690_v47, 4  ;;  %v1487_v36 = vsel %vm1477_vm10, %v1454_v37, %v1199_v30  ;;  %v4089_v47 = vld [vmem:[%s3421_s11 + $0xc4] sm:$0xf]  ;;  %v882_v27 = vrot.slane %v880_v53, 5 }
  0xe6   : > { %1352 = vrot.lane.b32.xlu0 %v4002_v54, %s3324_s27  ;;  %v1489_v30 = vsel %vm1477_vm10, %v1456_v10, %v1201_v57  ;;  %v4085_v57 = vcombine.low %v4007_v51, %v4010_v48  ;;  %v890_v48 = vshrl.u32 %v4089_v47, 16  ;;  %v886_v16 = vshll.u32 %v4089_v47, 16 }
  0xe7   : > { %1066 = vrot.lane.b32.xlu1 %v3983_v8, %s3320_s15  ;;  %v696_v50 = vor.u32 %v695_v7, %v692_v19  ;;  %v873_v19 = vrot.slane %v871_v61, 4  ;;  %v872_v51 = vsel %vm3443_vm4, %v2854_v17, %v871_v61 }
  0xe8   : > { %v1234_v63 = vpop.permute.xlu0 %1233  ;;  %v892_v22 = vrot.slane %v890_v48, 4 }
  0xe9   : > { %v1236_v14 = vpop.permute.xlu1 %1235  ;;  %v1520_v41 = vsel %vm1510_vm11, %v1487_v36, %v1234_v63  ;;  %v697_v4 = vrot.slane %v696_v50, 4  ;;  %v896_v50 = vshll.u32 %v322_v62, 16 }
  0xea   : > { %1144 = vrot.lane.b32.xlu0 %v3942_v60, %s3319_s14  ;;  %v4035_v60 = vld [vmem:[%s3421_s11 + $0xbc] sm:$0x1]  ;;  %v1522_v58 = vsel %vm1510_vm11, %v1489_v30, %v1236_v14  ;;  %v877_v14 = vshrl.u32 %v4078_v46, 16  ;;  %v2905_v30 = vcombine.low %v4078_v46, %v4089_v47 }
  0xeb   : > { %1146 = vrot.lane.b32.xlu1 %v4002_v54, %s3319_s14  ;;  %v709_v35 = vshll.u32 %v4035_v60, 16  ;;  %v702_v9 = vsel %vm3478_vm5, %v697_v4, %v701_v24 }
  0xec   : > { %v1269_v5 = vpop.permute.xlu0 %1268  ;;  %v879_v24 = vrot.slane %v877_v14, 4  ;;  %v325_v14 = vld [vmem:[%s3421_s11 + $0xd4] sm:$0x1] }
  0xed   : > { %v1271_v6 = vpop.permute.xlu1 %1270  ;;  %v1553_v38 = vsel %vm1543_vm12, %v1520_v41, %v1269_v5  ;;  %v711_v21 = vrot.slane %v709_v35, 5  ;;  %v874_v5 = vrot.slane %v4035_v60, 5 }
  0xee   : > { %1179 = vrot.lane.b32.xlu0 %v3959_v0, %s3317_s12  ;;  %v1555_v59 = vsel %vm1543_vm12, %v1522_v58, %v1271_v6  ;;  %v888_v6 = vrot.slane %v886_v16, 5  ;;  %v883_v37 = vor.u32 %v882_v27, %v879_v24  ;;  %v930_v24 = vshll.u32 %v325_v14, 16 }
  0xef   : > { %1181 = vrot.lane.b32.xlu1 %v4025_v44, %s3317_s12  ;;  %v875_v60 = vsel %vm3443_vm4, %v873_v19, %v874_v5 }
  0xf0   : > { %v1304_v1 = vpop.permute.xlu0 %1303  ;;  %v893_v25 = vor.u32 %v892_v22, %v888_v6  ;;  %v884_v41 = vrot.slane %v883_v37, 4 }
  0xf1   : > { %v1306_v55 = vpop.permute.xlu1 %1305  ;;  %v1586_v43 = vsel %vm1576_vm13, %v1553_v38, %v1304_v1  ;;  %v4127_v1 = vcombine.low %v872_v51, %v875_v60  ;;  %v898_v38 = vrot.slane %v896_v50, 5 }
  0xf2   : > { %1214 = vrot.lane.b32.xlu0 %v3983_v8, %s3321_s20  ;;  %v707_v8 = vrot.slane %v706_v15, 4  ;;  %v1588_v63 = vsel %vm1576_vm13, %v1555_v59, %v1306_v55  ;;  %v4132_v15 = vld [vmem:[%s3421_s11 + $0xcc] sm:$0xf]  ;;  %v4135_v55 = vld [vmem:[%s3421_s11 + $0xd0] sm:$0xf]  ;;  %v894_v33 = vrot.slane %v893_v25, 4 }
  0xf3   : > { %1216 = vrot.lane.b32.xlu1 %v4045_v31, %s3321_s20  ;;  %v914_v10 = vshll.u32 %v4132_v15, 16  ;;  %v2855_v59 = vrot.slane %v4078_v46, 9  ;;  %v932_v25 = vrot.slane %v930_v24, 5  ;;  %s3225_s11 = sshll.u32 %s3326_s10, 4  ;;  %s3226_s11 = int_to_ptr.vmem [resolvable:$false] %s3225_s11 }
  0xf4   : > { %v1339_v23 = vpop.permute.xlu0 %1338  ;;  %v712_v45 = vsel %vm3478_vm5, %v707_v8, %v711_v21  ;;  %v911_v21 = vshrl.u32 %v4132_v15, 16  ;;  %v899_v58 = vsel %vm3478_vm5, %v894_v33, %v898_v38  ;;  %v2908_v38 = vcombine.low %v4132_v15, %v4135_v55 }
  0xf5   : > { %v4070_v26 = vpop.permute.xlu1 %1052  ;;  %v1619_v32 = vsel %vm1609_vm14, %v1586_v43, %v1339_v23  ;;  %v4108_v2 = vcombine.low %v702_v9, %v712_v45  ;;  %v924_v43 = vshrl.u32 %v4135_v55, 16  ;;  %v920_v23 = vshll.u32 %v4135_v55, 16 }
  0xf6   : > { %1249 = vrot.lane.b32.xlu0 %v4002_v54, %s3318_s13  ;;  %3114 = vmatprep.mubr.msk.bf16.mxu0 %vm1662_vm15, %v1619_v32  ;;  %v889_v32 = vsel %vm3478_vm5, %v884_v41, %v888_v6  ;;  %v913_v61 = vrot.slane %v911_v21, 4  ;;  %v908_v9 = vrot.slane %v322_v62, 5 }
  0xf7   : > { %1251 = vrot.lane.b32.xlu1 %v4065_v42, %s3318_s13  ;;  %v922_v45 = vrot.slane %v920_v23, 5  ;;  %v2906_v46 = vcombine.low %v889_v32, %v899_v58  ;;  %v942_v23 = vrot.slane %v325_v14, 5 }
  0xf8   : > { %v1341_v54 = vpop.permute.xlu0 %1340 }
  0xf9   : > { %v4096_v39 = vpop.permute.xlu1 %1054  ;;  %v1621_v12 = vsel %vm1609_vm14, %v1588_v63, %v1341_v54  ;;  %v916_v63 = vrot.slane %v914_v10, 5 }
  0xfa   : > { %1284 = vrot.lane.b32.xlu0 %v4025_v44, %s3322_s24  ;;  %3115 = vmatmul.mubr.msk.bf16.gmra.mrb[8].mxu0 %vm1662_vm15, %v1621_v12  ;;  %v1386_v22 = vsel %vm1362_vm7, %v3653_v49, %v4096_v39 }
  0xfb   : > { %1286 = vrot.lane.b32.xlu1 %v4085_v57, %s3322_s24  ;;  %v917_v16 = vor.u32 %v916_v63, %v913_v61 }
  0xfc   : > { %v1133_v20 = vpop.permute.xlu0 %1132 }
  0xfd   : > { %v4112_v7 = vpop.permute.xlu1 %1134  ;;  %v918_v60 = vrot.slane %v917_v16, 4 }
  0xfe   : > { %1319 = vrot.lane.b32.xlu0 %v4045_v31, %s3323_s26  ;;  %v1427_v62 = vsel %vm1411_vm8, %v1386_v22, %v4112_v7 }
  0xff   : > { %1321 = vrot.lane.b32.xlu1 %v4108_v2, %s3323_s26 }
 0x100   : > { %v1168_v11 = vpop.permute.xlu0 %1167 }
 0x101   : > { %v4123_v35 = vpop.permute.xlu1 %1169 }
 0x102   : > { %1354 = vrot.lane.b32.xlu0 %v4065_v42, %s3324_s27  ;;  %v1460_v50 = vsel %vm1444_vm9, %v1427_v62, %v4123_v35 }
 0x103   : > { %1068 = vrot.lane.b32.xlu1 %v4045_v31, %s3320_s15  ;;  %v905_v31 = vrot.slane %v4089_v47, 5  ;;  %v926_v47 = vrot.slane %v924_v43, 4 }
 0x104   : > { %v1203_v36 = vpop.permute.xlu0 %1202 }
 0x105   : > { %v1205_v40 = vpop.permute.xlu1 %1204  ;;  %v907_v54 = vrot.slane %v905_v31, 4  ;;  %v906_v48 = vsel %vm3443_vm4, %v2855_v59, %v905_v31  ;;  %v927_v5 = vor.u32 %v926_v47, %v922_v45  ;;  %v3325_v59 = vmov 0  }
 0x106   : > { %1356 = vrot.lane.b32.xlu0 %v4127_v1, %s3324_s27 }
 0x107   : > { %1070 = vrot.lane.b32.xlu1 %v4108_v2, %s3320_s15  ;;  %v909_v19 = vsel %vm3443_vm4, %v907_v54, %v908_v9  ;;  %v928_v37 = vrot.slane %v927_v5, 4 }
 0x108   : > { %v1238_v4 = vpop.permute.xlu0 %1237 }
 0x109   : > { %v1240_v8 = vpop.permute.xlu1 %1239  ;;  %v933_v21 = vsel %vm3478_vm5, %v928_v37, %v932_v25 }
 0x10a   : > { %1148 = vrot.lane.b32.xlu0 %v4065_v42, %s3319_s14  ;;  %v1383_v42 = vsel %vm1362_vm7, %v3632_v3, %v4070_v26 }
 0x10b   : > { %1150 = vrot.lane.b32.xlu1 %v4127_v1, %s3319_s14  ;;  %v1425_v17 = vsel %vm1411_vm8, %v1383_v42, %v1133_v20  ;;  %v2907_v20 = vcombine.low %v906_v48, %v909_v19  ;;  %s254_s14 = scalar_lea.vmem [#allocation2], %s4721_s7 }
 0x10c   : > { %v1273_v12 = vpop.permute.xlu0 %1272  ;;  %v1458_v27 = vsel %vm1444_vm9, %v1425_v17, %v1168_v11  ;;  %s2712_s15 = sshll.u32 %s254_s14, 4  ;;  %s4751_s15 = int_to_ptr.vmem [resolvable:$true] %s2712_s15 }
 0x10d   : > { %v1275_v53 = vpop.permute.xlu1 %1274  ;;  %v1491_v26 = vsel %vm1477_vm10, %v1458_v27, %v1203_v36  ;;  %v939_v36 = vrot.slane %v4135_v55, 5  ;;  %s3221_s9 = scalar_lea.vmem %s4751_s15, 16  ;;  %p3228_p0 = scmp.lt.s32.totalorder %s4751_s15, %s3226_s11 }
 0x10e   : > { %1183 = vrot.lane.b32.xlu0 %v4085_v57, %s3317_s12  ;;  %v1524_v51 = vsel %vm1510_vm11, %v1491_v26, %v1238_v4  ;;  %p3222_p11 = scmp.ne.s32.totalorder %s4751_s15, %s3221_s9 }
 0x10f   : > { %1185 = vrot.lane.b32.xlu1 %v2905_v30, %s3317_s12  ;;  %v1557_v11 = vsel %vm1543_vm12, %v1524_v51, %v1273_v12  ;;  %v941_v43 = vrot.slane %v939_v36, 4  ;;  %s3227_s12 = scalar_lea.vmem %s3226_s11, 32 }
 0x110   : > { %v1308_v3 = vpop.permute.xlu0 %1307  ;;  %p3223_p12 = pnand %p3222_p11, %p3401_p5  ;;  %p3229_p1 = scmp.lt.s32.totalorder %s3227_s12, %s3221_s9 }
 0x111   : > { %v1310_v6 = vpop.permute.xlu1 %1309  ;;  %v1590_v49 = vsel %vm1576_vm13, %v1557_v11, %v1308_v3  ;;  %v943_v58 = vsel %vm3443_vm4, %v941_v43, %v942_v23 }
 0x112   : > { %1218 = vrot.lane.b32.xlu0 %v4108_v2, %s3321_s20  ;;  %v1493_v2 = vsel %vm1477_vm10, %v1460_v50, %v1205_v40  ;;  %v923_v40 = vsel %vm3478_vm5, %v918_v60, %v922_v45  ;;  %vm4242_vm5 = vmand %vm1929_vm1, %vm2454_vm3  ;;  %p3224_p13 = pneg %p3223_p12  ;;  %p3230_p2 = por %p3229_p1, %p3228_p0 }
 0x113   : > { %1220 = vrot.lane.b32.xlu1 %v2906_v46, %s3321_s20  ;;  %v1526_v33 = vsel %vm1510_vm11, %v1493_v2, %v1240_v8  ;;  %v2909_v55 = vcombine.low %v923_v40, %v933_v21 }
 0x114   : > { %v1343_v39 = vpop.permute.xlu0 %1342  ;;  %v1559_v35 = vsel %vm1543_vm12, %v1526_v33, %v1275_v53  ;;  %p3231_p3 = pnand %p3230_p2, %p3224_p13 }
 0x115   : > { %v4186_v41 = vpop.permute.xlu1 %1056  ;;  %v1623_v7 = vsel %vm1609_vm14, %v1590_v49, %v1343_v39  ;;  %v1592_v10 = vsel %vm1576_vm13, %v1559_v35, %v1310_v6 }
 0x116   : > { %1253 = vrot.lane.b32.xlu0 %v4127_v1, %s3318_s13  ;;  %3118 = vmatprep.mubr.msk.bf16.mxu0 %vm1662_vm15, %v1623_v7  ;;  %v2856_v1 = vrot.slane %v4132_v15, 9  ;;  %v1389_v27 = vsel %vm1362_vm7, %v3687_v29, %v4186_v41 }
 0x117   : > { %1255 = vrot.lane.b32.xlu1 %v2907_v20, %s3318_s13  ;;  %s4217_s13 = scalar_lea.vmem %s4830_s4, %s3146_s8  ;;  %s3045_s8 = sshll.u32 %s3384_s23, 4 }
 0x118   : > { %v1345_v31 = vpop.permute.xlu0 %1344  ;;  %v940_v32 = vsel %vm3443_vm4, %v2856_v1, %v939_v36  ;;  %2571 = vst.msk [vmem:[%s4217_s13] sm:$0xf] %vm2453_vm0, %v3325_v59  ;;  %2572 = vst.msk [vmem:[%s4217_s13 + $0x4] sm:$0xf] %vm2453_vm0, %v3325_v59  ;;  %s4749_s19 = scalar_lea.hbm %s4831_s5, %s3045_s8 }
 0x119   : > { %v1059_v4 = vpop.permute.xlu1 %1058  ;;  %v1625_v8 = vsel %vm1609_vm14, %v1592_v10, %v1345_v31  ;;  %2573 = vst.msk [vmem:[%s4217_s13 + $0x8] sm:$0x1] %vm1929_vm1, %v3325_v59  ;;  %3044 = vst.msk [vmem:[%s4217_s13 + $0xd4] sm:$0x1] %vm1929_vm1, %v3325_v59 }
 0x11a   : > { %1288 = vrot.lane.b32.xlu0 %v2905_v30, %s3322_s24  ;;  %3119 = vmatmul.mubr.msk.bf16.gmra.mrb[12].mxu0 %vm1662_vm15, %v1625_v8  ;;  %v2910_v30 = vcombine.low %v940_v32, %v943_v58  ;;  %3042 = vst.msk [vmem:[%s4217_s13 + $0xcc] sm:$0xf] %vm2453_vm0, %v3325_v59  ;;  %3043 = vst.msk [vmem:[%s4217_s13 + $0xd0] sm:$0xf] %vm2453_vm0, %v3325_v59 }
 0x11b   : > { %1290 = vrot.lane.b32.xlu1 %v2908_v38, %s3322_s24  ;;  %vm4236_vm4 = vmand %vm1929_vm1, %vm2129_vm2 }
 0x11c   : > { %v1137_v52 = vpop.permute.xlu0 %1136 }
 0x11d   : > { %v1139_v15 = vpop.permute.xlu1 %1138  ;;  %v1429_v3 = vsel %vm1411_vm8, %v1389_v27, %v1137_v52 }
 0x11e   : > { %1323 = vrot.lane.b32.xlu0 %v2906_v46, %s3323_s26 }
 0x11f   : > { %1325 = vrot.lane.b32.xlu1 %v2909_v55, %s3323_s26  ;;  %v2578_v47 = vld [vmem:[%s4217_s13] sm:$0x1]  ;;  %s4758_s26 = scalar_lea.hbm %s4832_s6, %s3045_s8 }
 0x120   : > { %v1172_v13 = vpop.permute.xlu0 %1171  ;;  %v2633_v14 = vld [vmem:[%s4217_s13 + $0x8] sm:$0x1]  ;;  %v2579_v42 = vsel %vm4236_vm4, 0, %v2578_v47  ;;  %v2684_v16 = vld [vmem:[%s4217_s13 + $0xd4] sm:$0x1] }
 0x121   : > { %v1174_v61 = vpop.permute.xlu1 %1173  ;;  %v2629_v12 = vld [vmem:[%s4217_s13 + $0xcc] sm:$0x1]  ;;  %v2634_v48 = vsel %vm4242_vm5, 0, %v2633_v14  ;;  %2580 = vst [vmem:[%s4217_s13] sm:$0x1] %v2579_v42  ;;  %v2685_v19 = vsel %vm4242_vm5, 0, %v2684_v16  ;;  %v1462_v26 = vsel %vm1444_vm9, %v1429_v3, %v1172_v13 }
 0x122   : > { %1358 = vrot.lane.b32.xlu0 %v2907_v20, %s3324_s27  ;;  %v2630_v46 = vsel %vm4236_vm4, 0, %v2629_v12  ;;  %2635 = vst [vmem:[%s4217_s13 + $0x8] sm:$0x1] %v2634_v48  ;;  %2686 = vst [vmem:[%s4217_s13 + $0xd4] sm:$0x1] %v2685_v19  ;;  %v1392_v20 = vsel %vm1362_vm7, %v3716_v56, %v1059_v4 }
 0x123   : > { %1360 = vrot.lane.b32.xlu1 %v2910_v30, %s3324_s27  ;;  %2631 = vst [vmem:[%s4217_s13 + $0xcc] sm:$0x1] %v2630_v46  ;;  %v1431_v62 = vsel %vm1411_vm8, %v1392_v20, %v1139_v15  ;;  %s2693_s27 = scalar_lea.sflag [#allocation3], %s4721_s7 }
 0x124   : > { %v1207_v63 = vpop.permute.xlu0 %1206  ;;  %v1464_v37 = vsel %vm1444_vm9, %v1431_v62, %v1174_v61 }
 0x125   : > { %v1209_v54 = vpop.permute.xlu1 %1208  ;;  %v1495_v22 = vsel %vm1477_vm10, %v1462_v26, %v1207_v63 }
 0x126   : > { %v1497_v50 = vsel %vm1477_vm10, %v1464_v37, %v1209_v54 }
 0x128   : > { %v1242_v53 = vpop.permute.xlu0 %1241 }
 0x129   : > { %v1244_v17 = vpop.permute.xlu1 %1243  ;;  %v1528_v60 = vsel %vm1510_vm11, %v1495_v22, %v1242_v53 }
 0x12a   : > { %v1530_v36 = vsel %vm1510_vm11, %v1497_v50, %v1244_v17 }
 0x12c   : > { %v1277_v5 = vpop.permute.xlu0 %1276 }
 0x12d   : > { %v1279_v24 = vpop.permute.xlu1 %1278  ;;  %v1561_v11 = vsel %vm1543_vm12, %v1528_v60, %v1277_v5 }
 0x12e   : > { %v1563_v56 = vsel %vm1543_vm12, %v1530_v36, %v1279_v24 }
 0x130   : > { %v1312_v6 = vpop.permute.xlu0 %1311 }
 0x131   : > { %v1314_v51 = vpop.permute.xlu1 %1313  ;;  %v1594_v29 = vsel %vm1576_vm13, %v1561_v11, %v1312_v6 }
 0x132   : > { %v1596_v2 = vsel %vm1576_vm13, %v1563_v56, %v1314_v51 }
 0x134   : > { %v1347_v25 = vpop.permute.xlu0 %1346 }
 0x135   : > { %v1061_v49 = vpop.permute.xlu1 %1060  ;;  %v1627_v39 = vsel %vm1609_vm14, %v1594_v29, %v1347_v25 }
 0x136   : > { %3122 = vmatprep.mubr.msk.bf16.mxu1 %vm1662_vm15, %v1627_v39  ;;  %v1395_v8 = vsel %vm1362_vm7, %v3782_v18, %v1061_v49 }
 0x138   : > { %v1349_v41 = vpop.permute.xlu0 %1348 }
 0x139   : > { %v1063_v7 = vpop.permute.xlu1 %1062  ;;  %v1629_v33 = vsel %vm1609_vm14, %v1596_v2, %v1349_v41 }
 0x13a   : > { %3123 = vmatmul.mubr.msk.bf16.vlgmr.msra.gmra.mrb[0].mxu1 %vm1662_vm15, %v1629_v33  ;;  %v1398_v30 = vsel %vm1362_vm7, %v3836_v34, %v1063_v7 }
 0x13c   : > { %v1141_v35 = vpop.permute.xlu0 %1140 }
 0x13d   : > { %v1143_v38 = vpop.permute.xlu1 %1142  ;;  %v1433_v55 = vsel %vm1411_vm8, %v1395_v8, %v1141_v35 }
 0x13e   : > { %v1435_v59 = vsel %vm1411_vm8, %v1398_v30, %v1143_v38 }
 0x140   : > { %v1176_v40 = vpop.permute.xlu0 %1175 }
 0x141   : > { %v1178_v21 = vpop.permute.xlu1 %1177  ;;  %v1466_v52 = vsel %vm1444_vm9, %v1433_v55, %v1176_v40 }
 0x142   : > { %v1468_v63 = vsel %vm1444_vm9, %v1435_v59, %v1178_v21 }
 0x144   : > { %v1211_v10 = vpop.permute.xlu0 %1210 }
 0x145   : > { %v1213_v31 = vpop.permute.xlu1 %1212  ;;  %v1499_v58 = vsel %vm1477_vm10, %v1466_v52, %v1211_v10 }
 0x146   : > { %v1501_v47 = vsel %vm1477_vm10, %v1468_v63, %v1213_v31 }
 0x148   : > { %v1246_v1 = vpop.permute.xlu0 %1245 }
 0x149   : > { %v1248_v43 = vpop.permute.xlu1 %1247  ;;  %v1532_v13 = vsel %vm1510_vm11, %v1499_v58, %v1246_v1 }
 0x14a   : > { %v1534_v53 = vsel %vm1510_vm11, %v1501_v47, %v1248_v43 }
 0x14c   : > { %v1281_v23 = vpop.permute.xlu0 %1280 }
 0x14d   : > { %v1283_v4 = vpop.permute.xlu1 %1282  ;;  %v1565_v61 = vsel %vm1543_vm12, %v1532_v13, %v1281_v23 }
 0x14e   : > { %v1567_v34 = vsel %vm1543_vm12, %v1534_v53, %v1283_v4 }
 0x150   : > { %v1316_v32 = vpop.permute.xlu0 %1315 }
 0x151   : > { %v1318_v15 = vpop.permute.xlu1 %1317  ;;  %v1598_v18 = vsel %vm1576_vm13, %v1565_v61, %v1316_v32 }
 0x152   : > { %v1600_v42 = vsel %vm1576_vm13, %v1567_v34, %v1318_v15 }
 0x154   : > { %v1351_v54 = vpop.permute.xlu0 %1350 }
 0x155   : > { %v1065_v12 = vpop.permute.xlu1 %1064  ;;  %v1631_v14 = vsel %vm1609_vm14, %v1598_v18, %v1351_v54 }
 0x156   : > { %3126 = vmatprep.mubr.msk.bf16.mxu1 %vm1662_vm15, %v1631_v14  ;;  %v1401_v20 = vsel %vm1362_vm7, %v3902_v28, %v1065_v12 }
 0x158   : > { %v1353_v46 = vpop.permute.xlu0 %1352 }
 0x159   : > { %v1067_v48 = vpop.permute.xlu1 %1066  ;;  %v1633_v16 = vsel %vm1609_vm14, %v1600_v42, %v1353_v46 }
 0x15a   : > { %3127 = vmatmul.mubr.msk.bf16.gmra.mrb[4].mxu1 %vm1662_vm15, %v1633_v16  ;;  %v1404_v25 = vsel %vm1362_vm7, %v3959_v0, %v1067_v48 }
 0x15c   : > { %v1145_v17 = vpop.permute.xlu0 %1144 }
 0x15d   : > { %v1147_v19 = vpop.permute.xlu1 %1146  ;;  %v1437_v60 = vsel %vm1411_vm8, %v1401_v20, %v1145_v17 }
 0x15e   : > { %v1439_v49 = vsel %vm1411_vm8, %v1404_v25, %v1147_v19 }
 0x160   : > { %v1180_v5 = vpop.permute.xlu0 %1179 }
 0x161   : > { %v1182_v24 = vpop.permute.xlu1 %1181  ;;  %v1470_v62 = vsel %vm1444_vm9, %v1437_v60, %v1180_v5 }
 0x162   : > { %v1472_v36 = vsel %vm1444_vm9, %v1439_v49, %v1182_v24 }
 0x164   : > { %v1215_v27 = vpop.permute.xlu0 %1214 }
 0x165   : > { %v1217_v3 = vpop.permute.xlu1 %1216  ;;  %v1503_v37 = vsel %vm1477_vm10, %v1470_v62, %v1215_v27 }
 0x166   : > { %v1505_v2 = vsel %vm1477_vm10, %v1472_v36, %v1217_v3 }
 0x168   : > { %v1250_v26 = vpop.permute.xlu0 %1249 }
 0x169   : > { %v1252_v6 = vpop.permute.xlu1 %1251  ;;  %v1536_v50 = vsel %vm1510_vm11, %v1503_v37, %v1250_v26  ;;  %v3035_v37 = vld [vmem:[%s4217_s13 + $0xbc] sm:$0x1] }
 0x16a   : > { %v1538_v33 = vsel %vm1510_vm11, %v1505_v2, %v1252_v6 }
 0x16c   : > { %v1285_v22 = vpop.permute.xlu0 %1284 }
 0x16d   : > { %v1287_v51 = vpop.permute.xlu1 %1286  ;;  %v1569_v39 = vsel %vm1543_vm12, %v1536_v50, %v1285_v22 }
 0x16e   : > { %v1571_v0 = vsel %vm1543_vm12, %v1538_v33, %v1287_v51 }
 0x170   : > { %v1320_v11 = vpop.permute.xlu0 %1319 }
 0x171   : > { %v1322_v29 = vpop.permute.xlu1 %1321  ;;  %v1602_v28 = vsel %vm1576_vm13, %v1569_v39, %v1320_v11 }
 0x172   : > { %v1604_v35 = vsel %vm1576_vm13, %v1571_v0, %v1322_v29  ;;  %v2967_v29 = vld [vmem:[%s4217_s13 + $0x18] sm:$0xf] }
 0x174   : > { %v1355_v56 = vpop.permute.xlu0 %1354 }
 0x175   : > { %v1069_v41 = vpop.permute.xlu1 %1068  ;;  %v1635_v7 = vsel %vm1609_vm14, %v1602_v28, %v1355_v56  ;;  %v2962_v56 = vld [vmem:[%s4217_s13 + $0xc] sm:$0xf] }
 0x176   : > { %3130 = vmatprep.mubr.msk.bf16.mxu1 %vm1662_vm15, %v1635_v7  ;;  %v1407_v52 = vsel %vm1362_vm7, %v4025_v44, %v1069_v41 }
 0x178   : > { %v1357_v38 = vpop.permute.xlu0 %1356 }
 0x179   : > { %v1071_v40 = vpop.permute.xlu1 %1070  ;;  %v1637_v21 = vsel %vm1609_vm14, %v1604_v35, %v1357_v38 }
 0x17a   : > { %3131 = vmatmul.mubr.msk.bf16.gmra.mrb[8].mxu1 %vm1662_vm15, %v1637_v21  ;;  %v1410_v32 = vsel %vm1362_vm7, %v4085_v57, %v1071_v40  ;;  %vm4345_vm7 = vmand %vm2453_vm0, %vm2454_vm3 }
 0x17c   : > { %v1149_v10 = vpop.permute.xlu0 %1148 }
 0x17d   : > { %v1151_v31 = vpop.permute.xlu1 %1150  ;;  %v1441_v15 = vsel %vm1411_vm8, %v1407_v52, %v1149_v10 }
 0x17e   : > { %v1443_v58 = vsel %vm1411_vm8, %v1410_v32, %v1151_v31 }
 0x180   : > { %v1184_v1 = vpop.permute.xlu0 %1183 }
 0x181   : > { %v1186_v43 = vpop.permute.xlu1 %1185  ;;  %v1474_v13 = vsel %vm1444_vm9, %v1441_v15, %v1184_v1 }
 0x182   : > { %v1476_v30 = vsel %vm1444_vm9, %v1443_v58, %v1186_v43  ;;  %vm4360_vm9 = vmor %vm2129_vm2, %vm2130_vm6 }
 0x184   : > { %v1219_v23 = vpop.permute.xlu0 %1218 }
 0x185   : > { %v1221_v4 = vpop.permute.xlu1 %1220  ;;  %v1507_v63 = vsel %vm1477_vm10, %v1474_v13, %v1219_v23 }
 0x186   : > { %v1509_v61 = vsel %vm1477_vm10, %v1476_v30, %v1221_v4  ;;  %v2970_v4 = vld [vmem:[%s4217_s13 + $0x20] sm:$0x1] }
 0x188   : > { %v1254_v8 = vpop.permute.xlu0 %1253 }
 0x189   : > { %v1256_v55 = vpop.permute.xlu1 %1255  ;;  %v1540_v57 = vsel %vm1510_vm11, %v1507_v63, %v1254_v8 }
 0x18a   : > { %v1542_v44 = vsel %vm1510_vm11, %v1509_v61, %v1256_v55 }
 0x18c   : > { %v1289_v59 = vpop.permute.xlu0 %1288 }
 0x18d   : > { %v1291_v18 = vpop.permute.xlu1 %1290  ;;  %v3108_v54 = vpop.f32.mrb[0].mxu0  ;;  %v1573_v34 = vsel %vm1543_vm12, %v1540_v57, %v1289_v59  ;;  %v2965_v57 = vld [vmem:[%s4217_s13 + $0x14] sm:$0x1] }
 0x18e   : > { %v1933_v47 = vmul.f32 %v3108_v54, %v3108_v54  ;;  %v3051_v12 = vpack.c.bf16 %v3108_v54, %v3108_v54  ;;  %v1733_v14 = vpop.f32.mrb[1].mxu0  ;;  %v1575_v53 = vsel %vm1543_vm12, %v1542_v44, %v1291_v18  ;;  %v1863_v16 = vsel %vm1411_vm8, %v3108_v54, 0.0 }
 0x18f   : > { %v1931_v42 = vmul.f32 %v1733_v14, %v1733_v14  ;;  %v3049_v46 = vpack.c.bf16 %v1733_v14, %v1733_v14  ;;  %v3109_v48 = vpop.f32.mrb[2].mxu0  ;;  %v1860_v5 = vsel %vm1411_vm8, %v1733_v14, 0.0 }
 0x190   : > { %v1966_v17 = vsel %vm1411_vm8, %v1933_v47, 0.0  ;;  %v2150_v19 = vshrl.u32 %v3051_v12, 16  ;;  %v1736_v24 = vpop.f32.mrb[3].mxu0  ;;  %v1324_v27 = vpop.permute.xlu0 %1323  ;;  %v2153_v3 = vshll.u32 %v3051_v12, 16  ;;  %v1865_v22 = vsel %vm1411_vm8, %v3109_v48, 0.0 }
 0x191   : > { %v1963_v26 = vsel %vm1411_vm8, %v1931_v42, 0.0  ;;  %v2133_v6 = vshrl.u32 %v3049_v46, 16  ;;  %v1326_v51 = vpop.permute.xlu1 %1325  ;;  %v2136_v60 = vshll.u32 %v3049_v46, 16  ;;  %v3052_v62 = vpack.c.bf16 %v3109_v48, %v3109_v48 }
 0x192   : > { %v2152_v20 = vrot.slane %v2150_v19, 7  ;;  %v1861_v11 = vsel %vm1411_vm8, %v1736_v24, 0.0  ;;  %v1934_v50 = vmul.f32 %v3109_v48, %v3109_v48  ;;  %v1932_v39 = vmul.f32 %v1736_v24, %v1736_v24 }
 0x193   : > { %v2135_v25 = vrot.slane %v2133_v6, 7  ;;  %v1862_v49 = vadd.f32 %v1861_v11, %v1860_v5  ;;  %v2158_v2 = vshrl.u32 %v3052_v62, 16  ;;  %v1608_v41 = vsel %vm1576_vm13, %v1575_v53, %v1326_v51 }
 0x194   : > { %v2155_v36 = vor.u32 %v2153_v3, %v2152_v20  ;;  %v2156_v28 = vrot.slane %v2152_v20, 4  ;;  %v2161_v33 = vshll.u32 %v3052_v62, 16  ;;  %v1964_v35 = vsel %vm1411_vm8, %v1932_v39, 0.0  ;;  %v1359_v1 = vpop.permute.xlu0 %1358 }
 0x195   : > { %v2138_v7 = vor.u32 %v2136_v60, %v2135_v25  ;;  %v1864_v0 = vadd.f32 %v1863_v16, %v1862_v49  ;;  %v1361_v38 = vpop.permute.xlu1 %1360  ;;  %v2160_v21 = vrot.slane %v2158_v2, 7  ;;  %v1965_v10 = vadd.f32 %v1964_v35, %v1963_v26 }
 0x196   : > { %v2467_v40 = vsel %vm4345_vm7, %v2155_v36, %v2967_v29  ;;  %v3050_v31 = vpack.c.bf16 %v1736_v24, %v1736_v24  ;;  %v1606_v8 = vsel %vm1576_vm13, %v1573_v34, %v1324_v27  ;;  %v1641_v55 = vsel %vm1609_vm14, %v1608_v41, %v1361_v38  ;;  %v2977_v41 = vld [vmem:[%s4217_s13 + $0x30] sm:$0xf] }
 0x197   : > { %2968 = vst [vmem:[%s4217_s13 + $0x18] sm:$0xf] %v2467_v40  ;;  %v2457_v43 = vsel %vm4345_vm7, %v2138_v7, %v2962_v56  ;;  %v1866_v52 = vadd.f32 %v1865_v22, %v1864_v0  ;;  %v2163_v32 = vor.u32 %v2161_v33, %v2160_v21  ;;  %v2165_v58 = vrot.slane %v2160_v21, 4  ;;  %v2972_v21 = vld [vmem:[%s4217_s13 + $0x24] sm:$0xf] }
 0x198   : > { %2963 = vst [vmem:[%s4217_s13 + $0xc] sm:$0xf] %v2457_v43  ;;  %v1967_v15 = vadd.f32 %v1966_v17, %v1965_v10  ;;  %v2141_v30 = vshrl.u32 %v3050_v31, 16  ;;  %v1968_v13 = vsel %vm1411_vm8, %v1934_v50, 0.0  ;;  %v2144_v59 = vshll.u32 %v3050_v31, 16 }
 0x199   : > { %v1639_v61 = vsel %vm1609_vm14, %v1606_v8, %v1359_v1  ;;  %v2164_v63 = vsel %vm4360_vm9, %v2156_v28, %v2163_v32  ;;  %v2471_v18 = vsel %vm4236_vm4, %v2165_v58, %v2970_v4  ;;  %v2139_v47 = vrot.slane %v2135_v25, 4 }
 0x19a   : > { %v2143_v54 = vrot.slane %v2141_v30, 7  ;;  %3134 = vmatprep.mubr.msk.bf16.mxu1 %vm1662_vm15, %v1639_v61  ;;  %v1969_v44 = vadd.f32 %v1968_v13, %v1967_v15  ;;  %2969 = vst.msk [vmem:[%s4217_s13 + $0x1c] sm:$0xf] %vm2453_vm0, %v2164_v63  ;;  %2971 = vst [vmem:[%s4217_s13 + $0x20] sm:$0x1] %v2471_v18 }
 0x19b   : > { %3135 = vmatmul.mubr.msk.bf16.gmra.mrb[12].mxu1 %vm1662_vm15, %v1641_v55  ;;  %v2980_v13 = vld [vmem:[%s4217_s13 + $0x38] sm:$0x1] }
 0x19c   : > { %v2146_v12 = vor.u32 %v2144_v59, %v2143_v54  ;;  %v2148_v14 = vrot.slane %v2143_v54, 4 }
 0x19e   : > { %v2584_v53 = vld [vmem:[%s4217_s13 + $0x18] sm:$0x1]  ;;  %v2147_v34 = vsel %vm4360_vm9, %v2139_v47, %v2146_v12  ;;  %v2464_v42 = vsel %vm4236_vm4, %v2148_v14, %v2965_v57  ;;  %v2975_v14 = vld [vmem:[%s4217_s13 + $0x2c] sm:$0x1] }
 0x19f   : > { %v2581_v46 = vld [vmem:[%s4217_s13 + $0xc] sm:$0x1]  ;;  %v2585_v48 = vsel %vm4236_vm4, 0, %v2584_v53  ;;  %2964 = vst.msk [vmem:[%s4217_s13 + $0x10] sm:$0xf] %vm2453_vm0, %v2147_v34 }
 0x1a0   : > { %2966 = vst [vmem:[%s4217_s13 + $0x14] sm:$0x1] %v2464_v42  ;;  %v2582_v16 = vsel %vm4236_vm4, 0, %v2581_v46  ;;  %2586 = vst [vmem:[%s4217_s13 + $0x18] sm:$0x1] %v2585_v48 }
 0x1a1   : > { %2583 = vst [vmem:[%s4217_s13 + $0xc] sm:$0x1] %v2582_v16  ;;  %v2639_v17 = vld [vmem:[%s4217_s13 + $0x20] sm:$0x1] }
 0x1a2   : > { %v2640_v19 = vsel %vm4242_vm5, 0, %v2639_v17 }
 0x1a3   : > { %2641 = vst [vmem:[%s4217_s13 + $0x20] sm:$0x1] %v2640_v19 }
 0x1a7   : > { %v2636_v5 = vld [vmem:[%s4217_s13 + $0x14] sm:$0x1] }
 0x1a8   : > { %v2637_v24 = vsel %vm4242_vm5, 0, %v2636_v5 }
 0x1a9   : > { %2638 = vst [vmem:[%s4217_s13 + $0x14] sm:$0x1] %v2637_v24 }
 0x1ad   : > { %v3112_v27 = vpop.f32.mrb[4].mxu0 }
 0x1ae   : > { %v3055_v3 = vpack.c.bf16 %v3112_v27, %v3112_v27  ;;  %v1749_v26 = vpop.f32.mrb[5].mxu0  ;;  %v1937_v60 = vmul.f32 %v3112_v27, %v3112_v27  ;;  %v1871_v25 = vsel %vm1411_vm8, %v3112_v27, 0.0 }
 0x1af   : > { %v1867_v6 = vsel %vm1411_vm8, %v1749_v26, 0.0  ;;  %v1935_v22 = vmul.f32 %v1749_v26, %v1749_v26  ;;  %v3053_v51 = vpack.c.bf16 %v1749_v26, %v1749_v26  ;;  %v3113_v20 = vpop.f32.mrb[6].mxu0 }
 0x1b0   : > { %v2184_v62 = vshrl.u32 %v3055_v3, 16  ;;  %v1868_v11 = vadd.f32 %v1867_v6, %v1866_v52  ;;  %v1752_v29 = vpop.f32.mrb[7].mxu0  ;;  %v2187_v50 = vshll.u32 %v3055_v3, 16  ;;  %v3056_v2 = vpack.c.bf16 %v3113_v20, %v3113_v20 }
 0x1b1   : > { %v1970_v49 = vsel %vm1411_vm8, %v1935_v22, 0.0  ;;  %v2167_v39 = vshrl.u32 %v3053_v51, 16  ;;  %v2170_v56 = vshll.u32 %v3053_v51, 16  ;;  %v1869_v33 = vsel %vm1411_vm8, %v1752_v29, 0.0 }
 0x1b2   : > { %v2186_v36 = vrot.slane %v2184_v62, 7  ;;  %v1971_v28 = vadd.f32 %v1970_v49, %v1969_v44  ;;  %v1936_v0 = vmul.f32 %v1752_v29, %v1752_v29  ;;  %v3054_v35 = vpack.c.bf16 %v1752_v29, %v1752_v29 }
 0x1b3   : > { %v2169_v7 = vrot.slane %v2167_v39, 7  ;;  %v1974_v38 = vsel %vm1411_vm8, %v1937_v60, 0.0  ;;  %v1873_v10 = vsel %vm1411_vm8, %v3113_v20, 0.0  ;;  %v2192_v31 = vshrl.u32 %v3056_v2, 16 }
 0x1b4   : > { %v2189_v40 = vor.u32 %v2187_v50, %v2186_v36  ;;  %v1938_v43 = vmul.f32 %v3113_v20, %v3113_v20  ;;  %v2195_v4 = vshll.u32 %v3056_v2, 16  ;;  %v1870_v8 = vadd.f32 %v1869_v33, %v1868_v11 }
 0x1b5   : > { %v2172_v1 = vor.u32 %v2170_v56, %v2169_v7  ;;  %v2194_v52 = vrot.slane %v2192_v31, 7  ;;  %v1972_v32 = vsel %vm1411_vm8, %v1936_v0, 0.0  ;;  %v2175_v58 = vshrl.u32 %v3054_v35, 16 }
 0x1b6   : > { %v2481_v55 = vsel %vm4345_vm7, %v2189_v40, %v2977_v41  ;;  %v2190_v15 = vrot.slane %v2186_v36, 4  ;;  %v1872_v59 = vadd.f32 %v1871_v25, %v1870_v8  ;;  %v1973_v61 = vadd.f32 %v1972_v32, %v1971_v28  ;;  %v2987_v40 = vld [vmem:[%s4217_s13 + $0x48] sm:$0xf]  ;;  %v2982_v8 = vld [vmem:[%s4217_s13 + $0x3c] sm:$0xf] }
 0x1b7   : > { %2978 = vst [vmem:[%s4217_s13 + $0x30] sm:$0xf] %v2481_v55  ;;  %v2474_v30 = vsel %vm4345_vm7, %v2172_v1, %v2972_v21  ;;  %v2197_v63 = vor.u32 %v2195_v4, %v2194_v52  ;;  %v2199_v18 = vrot.slane %v2194_v52, 4  ;;  %v2177_v54 = vrot.slane %v2175_v58, 7 }
 0x1b8   : > { %2973 = vst [vmem:[%s4217_s13 + $0x24] sm:$0xf] %v2474_v30  ;;  %v2178_v44 = vshll.u32 %v3054_v35, 16  ;;  %v2173_v57 = vrot.slane %v2169_v7, 4  ;;  %v1976_v47 = vsel %vm1411_vm8, %v1938_v43, 0.0  ;;  %v1975_v12 = vadd.f32 %v1974_v38, %v1973_v61 }
 0x1b9   : > { %v1874_v53 = vadd.f32 %v1873_v10, %v1872_v59  ;;  %v2198_v34 = vsel %vm4360_vm9, %v2190_v15, %v2197_v63  ;;  %v2485_v42 = vsel %vm4236_vm4, %v2199_v18, %v2980_v13  ;;  %v2182_v48 = vrot.slane %v2177_v54, 4 }
 0x1ba   : > { %v2180_v46 = vor.u32 %v2178_v44, %v2177_v54  ;;  %2979 = vst.msk [vmem:[%s4217_s13 + $0x34] sm:$0xf] %vm2453_vm0, %v2198_v34  ;;  %2981 = vst [vmem:[%s4217_s13 + $0x38] sm:$0x1] %v2485_v42  ;;  %v1977_v16 = vadd.f32 %v1976_v47, %v1975_v12  ;;  %v2990_v44 = vld [vmem:[%s4217_s13 + $0x50] sm:$0x1] }
 0x1bb   : > { %v2478_v19 = vsel %vm4236_vm4, %v2182_v48, %v2975_v14 }
 0x1bc   : > { %v2181_v17 = vsel %vm4360_vm9, %v2173_v57, %v2180_v46  ;;  %2976 = vst [vmem:[%s4217_s13 + $0x2c] sm:$0x1] %v2478_v19 }
 0x1bd   : > { %2974 = vst.msk [vmem:[%s4217_s13 + $0x28] sm:$0xf] %vm2453_vm0, %v2181_v17 }
 0x1be   : > { %v2590_v5 = vld [vmem:[%s4217_s13 + $0x30] sm:$0x1] }
 0x1bf   : > { %v2591_v24 = vsel %vm4236_vm4, 0, %v2590_v5  ;;  %v2587_v27 = vld [vmem:[%s4217_s13 + $0x24] sm:$0x1] }
 0x1c0   : > { %2592 = vst [vmem:[%s4217_s13 + $0x30] sm:$0x1] %v2591_v24  ;;  %v2588_v3 = vsel %vm4236_vm4, 0, %v2587_v27 }
 0x1c1   : > { %2589 = vst [vmem:[%s4217_s13 + $0x24] sm:$0x1] %v2588_v3  ;;  %v2645_v26 = vld [vmem:[%s4217_s13 + $0x38] sm:$0x1] }
 0x1c2   : > { %v2646_v6 = vsel %vm4242_vm5, 0, %v2645_v26 }
 0x1c3   : > { %2647 = vst [vmem:[%s4217_s13 + $0x38] sm:$0x1] %v2646_v6  ;;  %v2642_v22 = vld [vmem:[%s4217_s13 + $0x2c] sm:$0x1] }
 0x1c4   : > { %v2643_v51 = vsel %vm4242_vm5, 0, %v2642_v22 }
 0x1c5   : > { %2644 = vst [vmem:[%s4217_s13 + $0x2c] sm:$0x1] %v2643_v51 }
 0x1cd   : > { %v3116_v20 = vpop.f32.mrb[8].mxu0 }
 0x1ce   : > { %v3059_v60 = vpack.c.bf16 %v3116_v20, %v3116_v20  ;;  %v1765_v62 = vpop.f32.mrb[9].mxu0  ;;  %v1941_v49 = vmul.f32 %v3116_v20, %v3116_v20  ;;  %v1879_v56 = vsel %vm1411_vm8, %v3116_v20, 0.0 }
 0x1cf   : > { %v1875_v11 = vsel %vm1411_vm8, %v1765_v62, 0.0  ;;  %v1939_v29 = vmul.f32 %v1765_v62, %v1765_v62  ;;  %v3057_v25 = vpack.c.bf16 %v1765_v62, %v1765_v62  ;;  %v3117_v50 = vpop.f32.mrb[10].mxu0 }
 0x1d0   : > { %v2218_v39 = vshrl.u32 %v3059_v60, 16  ;;  %v1876_v36 = vadd.f32 %v1875_v11, %v1874_v53  ;;  %v1768_v28 = vpop.f32.mrb[11].mxu0  ;;  %v2221_v2 = vshll.u32 %v3059_v60, 16  ;;  %v3060_v38 = vpack.c.bf16 %v3117_v50, %v3117_v50 }
 0x1d1   : > { %v1978_v41 = vsel %vm1411_vm8, %v1939_v29, 0.0  ;;  %v2201_v7 = vshrl.u32 %v3057_v25, 16  ;;  %v2204_v35 = vshll.u32 %v3057_v25, 16  ;;  %v1877_v10 = vsel %vm1411_vm8, %v1768_v28, 0.0 }
 0x1d2   : > { %v2220_v33 = vrot.slane %v2218_v39, 7  ;;  %v1979_v0 = vadd.f32 %v1978_v41, %v1977_v16  ;;  %v1940_v31 = vmul.f32 %v1768_v28, %v1768_v28  ;;  %v3058_v1 = vpack.c.bf16 %v1768_v28, %v1768_v28  ;;  %v2985_v16 = vld [vmem:[%s4217_s13 + $0x44] sm:$0x1] }
 0x1d3   : > { %v2203_v21 = vrot.slane %v2201_v7, 7  ;;  %v1982_v43 = vsel %vm1411_vm8, %v1941_v49, 0.0  ;;  %v1881_v55 = vsel %vm1411_vm8, %v3117_v50, 0.0  ;;  %v2226_v52 = vshrl.u32 %v3060_v38, 16 }
 0x1d4   : > { %v2223_v4 = vor.u32 %v2221_v2, %v2220_v33  ;;  %v1942_v58 = vmul.f32 %v3117_v50, %v3117_v50  ;;  %v2229_v15 = vshll.u32 %v3060_v38, 16  ;;  %v1878_v30 = vadd.f32 %v1877_v10, %v1876_v36 }
 0x1d5   : > { %v2206_v32 = vor.u32 %v2204_v35, %v2203_v21  ;;  %v2228_v59 = vrot.slane %v2226_v52, 7  ;;  %v1980_v61 = vsel %vm1411_vm8, %v1940_v31, 0.0  ;;  %v2209_v63 = vshrl.u32 %v3058_v1, 16 }
 0x1d6   : > { %v2495_v13 = vsel %vm4345_vm7, %v2223_v4, %v2987_v40  ;;  %v2224_v18 = vrot.slane %v2220_v33, 4  ;;  %v1880_v57 = vadd.f32 %v1879_v56, %v1878_v30  ;;  %v1981_v47 = vadd.f32 %v1980_v61, %v1979_v0  ;;  %v2997_v4 = vld [vmem:[%s4217_s13 + $0x60] sm:$0xf]  ;;  %v2992_v30 = vld [vmem:[%s4217_s13 + $0x54] sm:$0xf] }
 0x1d7   : > { %2988 = vst [vmem:[%s4217_s13 + $0x48] sm:$0xf] %v2495_v13  ;;  %v2488_v54 = vsel %vm4345_vm7, %v2206_v32, %v2982_v8  ;;  %v2231_v12 = vor.u32 %v2229_v15, %v2228_v59  ;;  %v2233_v14 = vrot.slane %v2228_v59, 4  ;;  %v2211_v53 = vrot.slane %v2209_v63, 7 }
 0x1d8   : > { %2983 = vst [vmem:[%s4217_s13 + $0x3c] sm:$0xf] %v2488_v54  ;;  %v2212_v34 = vshll.u32 %v3058_v1, 16  ;;  %v2207_v42 = vrot.slane %v2203_v21, 4  ;;  %v1984_v46 = vsel %vm1411_vm8, %v1942_v58, 0.0  ;;  %v1983_v48 = vadd.f32 %v1982_v43, %v1981_v47 }
 0x1d9   : > { %v1882_v17 = vadd.f32 %v1881_v55, %v1880_v57  ;;  %v2232_v19 = vsel %vm4360_vm9, %v2224_v18, %v2231_v12  ;;  %v2499_v5 = vsel %vm4236_vm4, %v2233_v14, %v2990_v44  ;;  %v2216_v27 = vrot.slane %v2211_v53, 4 }
 0x1da   : > { %v2214_v24 = vor.u32 %v2212_v34, %v2211_v53  ;;  %2989 = vst.msk [vmem:[%s4217_s13 + $0x4c] sm:$0xf] %vm2453_vm0, %v2232_v19  ;;  %2991 = vst [vmem:[%s4217_s13 + $0x50] sm:$0x1] %v2499_v5  ;;  %v1985_v3 = vadd.f32 %v1984_v46, %v1983_v48  ;;  %v3000_v34 = vld [vmem:[%s4217_s13 + $0x68] sm:$0x1] }
 0x1db   : > { %v2492_v6 = vsel %vm4236_vm4, %v2216_v27, %v2985_v16 }
 0x1dc   : > { %v2215_v26 = vsel %vm4360_vm9, %v2207_v42, %v2214_v24  ;;  %2986 = vst [vmem:[%s4217_s13 + $0x44] sm:$0x1] %v2492_v6 }
 0x1dd   : > { %2984 = vst.msk [vmem:[%s4217_s13 + $0x40] sm:$0xf] %vm2453_vm0, %v2215_v26 }
 0x1de   : > { %v2596_v22 = vld [vmem:[%s4217_s13 + $0x48] sm:$0x1] }
 0x1df   : > { %v2597_v51 = vsel %vm4236_vm4, 0, %v2596_v22  ;;  %v2593_v20 = vld [vmem:[%s4217_s13 + $0x3c] sm:$0x1] }
 0x1e0   : > { %2598 = vst [vmem:[%s4217_s13 + $0x48] sm:$0x1] %v2597_v51  ;;  %v2594_v60 = vsel %vm4236_vm4, 0, %v2593_v20 }
 0x1e1   : > { %2595 = vst [vmem:[%s4217_s13 + $0x3c] sm:$0x1] %v2594_v60  ;;  %v2651_v62 = vld [vmem:[%s4217_s13 + $0x50] sm:$0x1] }
 0x1e2   : > { %v2652_v11 = vsel %vm4242_vm5, 0, %v2651_v62 }
 0x1e3   : > { %2653 = vst [vmem:[%s4217_s13 + $0x50] sm:$0x1] %v2652_v11  ;;  %v2648_v29 = vld [vmem:[%s4217_s13 + $0x44] sm:$0x1] }
 0x1e4   : > { %v2649_v25 = vsel %vm4242_vm5, 0, %v2648_v29 }
 0x1e5   : > { %2650 = vst [vmem:[%s4217_s13 + $0x44] sm:$0x1] %v2649_v25 }
 0x1ed   : > { %v3120_v50 = vpop.f32.mrb[12].mxu0 }
 0x1ee   : > { %v3063_v49 = vpack.c.bf16 %v3120_v50, %v3120_v50  ;;  %v1781_v39 = vpop.f32.mrb[13].mxu0  ;;  %v1945_v41 = vmul.f32 %v3120_v50, %v3120_v50  ;;  %v1887_v35 = vsel %vm1411_vm8, %v3120_v50, 0.0 }
 0x1ef   : > { %v1883_v36 = vsel %vm1411_vm8, %v1781_v39, 0.0  ;;  %v1943_v28 = vmul.f32 %v1781_v39, %v1781_v39  ;;  %v3061_v56 = vpack.c.bf16 %v1781_v39, %v1781_v39  ;;  %v3121_v2 = vpop.f32.mrb[14].mxu0 }
 0x1f0   : > { %v2252_v7 = vshrl.u32 %v3063_v49, 16  ;;  %v1884_v33 = vadd.f32 %v1883_v36, %v1882_v17  ;;  %v1784_v0 = vpop.f32.mrb[15].mxu0  ;;  %v2255_v38 = vshll.u32 %v3063_v49, 16  ;;  %v3064_v43 = vpack.c.bf16 %v3121_v2, %v3121_v2 }
 0x1f1   : > { %v1986_v40 = vsel %vm1411_vm8, %v1943_v28, 0.0  ;;  %v2235_v21 = vshrl.u32 %v3061_v56, 16  ;;  %v2238_v1 = vshll.u32 %v3061_v56, 16  ;;  %v1885_v55 = vsel %vm1411_vm8, %v1784_v0, 0.0 }
 0x1f2   : > { %v2254_v10 = vrot.slane %v2252_v7, 7  ;;  %v1987_v31 = vadd.f32 %v1986_v40, %v1985_v3  ;;  %v1944_v52 = vmul.f32 %v1784_v0, %v1784_v0  ;;  %v3062_v32 = vpack.c.bf16 %v1784_v0, %v1784_v0  ;;  %v2995_v3 = vld [vmem:[%s4217_s13 + $0x5c] sm:$0x1] }
 0x1f3   : > { %v2237_v8 = vrot.slane %v2235_v21, 7  ;;  %v1990_v58 = vsel %vm1411_vm8, %v1945_v41, 0.0  ;;  %v1889_v13 = vsel %vm1411_vm8, %v3121_v2, 0.0  ;;  %v2260_v59 = vshrl.u32 %v3064_v43, 16 }
 0x1f4   : > { %v2257_v15 = vor.u32 %v2255_v38, %v2254_v10  ;;  %v1946_v63 = vmul.f32 %v3121_v2, %v3121_v2  ;;  %v2263_v18 = vshll.u32 %v3064_v43, 16  ;;  %v1886_v54 = vadd.f32 %v1885_v55, %v1884_v33 }
 0x1f5   : > { %v2240_v61 = vor.u32 %v2238_v1, %v2237_v8  ;;  %v2262_v57 = vrot.slane %v2260_v59, 7  ;;  %v1988_v47 = vsel %vm1411_vm8, %v1944_v52, 0.0  ;;  %v2243_v12 = vshrl.u32 %v3062_v32, 16 }
 0x1f6   : > { %v2509_v44 = vsel %vm4345_vm7, %v2257_v15, %v2997_v4  ;;  %v2258_v14 = vrot.slane %v2254_v10, 4  ;;  %v1888_v42 = vadd.f32 %v1887_v35, %v1886_v54  ;;  %v1989_v46 = vadd.f32 %v1988_v47, %v1987_v31  ;;  %v3007_v15 = vld [vmem:[%s4217_s13 + $0x78] sm:$0xf]  ;;  %v3002_v54 = vld [vmem:[%s4217_s13 + $0x6c] sm:$0xf] }
 0x1f7   : > { %2998 = vst [vmem:[%s4217_s13 + $0x60] sm:$0xf] %v2509_v44  ;;  %v2502_v53 = vsel %vm4345_vm7, %v2240_v61, %v2992_v30  ;;  %v2265_v48 = vor.u32 %v2263_v18, %v2262_v57  ;;  %v2267_v16 = vrot.slane %v2262_v57, 4  ;;  %v2245_v17 = vrot.slane %v2243_v12, 7 }
 0x1f8   : > { %2993 = vst [vmem:[%s4217_s13 + $0x54] sm:$0xf] %v2502_v53  ;;  %v2246_v19 = vshll.u32 %v3062_v32, 16  ;;  %v2241_v5 = vrot.slane %v2237_v8, 4  ;;  %v1992_v24 = vsel %vm1411_vm8, %v1946_v63, 0.0  ;;  %v1991_v27 = vadd.f32 %v1990_v58, %v1989_v46 }
 0x1f9   : > { %v1890_v26 = vadd.f32 %v1889_v13, %v1888_v42  ;;  %v2266_v6 = vsel %vm4360_vm9, %v2258_v14, %v2265_v48  ;;  %v2513_v22 = vsel %vm4236_vm4, %v2267_v16, %v3000_v34  ;;  %v2250_v20 = vrot.slane %v2245_v17, 4 }
 0x1fa   : > { %v2248_v51 = vor.u32 %v2246_v19, %v2245_v17  ;;  %2999 = vst.msk [vmem:[%s4217_s13 + $0x64] sm:$0xf] %vm2453_vm0, %v2266_v6  ;;  %3001 = vst [vmem:[%s4217_s13 + $0x68] sm:$0x1] %v2513_v22  ;;  %v1993_v60 = vadd.f32 %v1992_v24, %v1991_v27  ;;  %v3010_v19 = vld [vmem:[%s4217_s13 + $0x80] sm:$0x1] }
 0x1fb   : > { %v2506_v11 = vsel %vm4236_vm4, %v2250_v20, %v2995_v3 }
 0x1fc   : > { %v2249_v62 = vsel %vm4360_vm9, %v2241_v5, %v2248_v51  ;;  %2996 = vst [vmem:[%s4217_s13 + $0x5c] sm:$0x1] %v2506_v11 }
 0x1fd   : > { %2994 = vst.msk [vmem:[%s4217_s13 + $0x58] sm:$0xf] %vm2453_vm0, %v2249_v62 }
 0x1fe   : > { %v2602_v29 = vld [vmem:[%s4217_s13 + $0x60] sm:$0x1] }
 0x1ff   : > { %v2603_v25 = vsel %vm4236_vm4, 0, %v2602_v29  ;;  %v2599_v50 = vld [vmem:[%s4217_s13 + $0x54] sm:$0x1] }
 0x200   : > { %2604 = vst [vmem:[%s4217_s13 + $0x60] sm:$0x1] %v2603_v25  ;;  %v2600_v49 = vsel %vm4236_vm4, 0, %v2599_v50 }
 0x201   : > { %2601 = vst [vmem:[%s4217_s13 + $0x54] sm:$0x1] %v2600_v49  ;;  %v2657_v39 = vld [vmem:[%s4217_s13 + $0x68] sm:$0x1] }
 0x202   : > { %v2658_v36 = vsel %vm4242_vm5, 0, %v2657_v39 }
 0x203   : > { %2659 = vst [vmem:[%s4217_s13 + $0x68] sm:$0x1] %v2658_v36  ;;  %v2654_v28 = vld [vmem:[%s4217_s13 + $0x5c] sm:$0x1] }
 0x204   : > { %v2655_v56 = vsel %vm4242_vm5, 0, %v2654_v28 }
 0x205   : > { %2656 = vst [vmem:[%s4217_s13 + $0x5c] sm:$0x1] %v2655_v56 }
 0x20d   : > { %v3124_v2 = vpop.f32.mrb[0].mxu1 }
 0x20e   : > { %v3067_v41 = vpack.c.bf16 %v3124_v2, %v3124_v2  ;;  %v1797_v7 = vpop.f32.mrb[1].mxu1  ;;  %v1949_v40 = vmul.f32 %v3124_v2, %v3124_v2  ;;  %v1895_v1 = vsel %vm1411_vm8, %v3124_v2, 0.0 }
 0x20f   : > { %v1891_v33 = vsel %vm1411_vm8, %v1797_v7, 0.0  ;;  %v1947_v0 = vmul.f32 %v1797_v7, %v1797_v7  ;;  %v3065_v35 = vpack.c.bf16 %v1797_v7, %v1797_v7  ;;  %v3125_v38 = vpop.f32.mrb[2].mxu1 }
 0x210   : > { %v2286_v21 = vshrl.u32 %v3067_v41, 16  ;;  %v1892_v10 = vadd.f32 %v1891_v33, %v1890_v26  ;;  %v1800_v31 = vpop.f32.mrb[3].mxu1  ;;  %v2289_v43 = vshll.u32 %v3067_v41, 16  ;;  %v3068_v58 = vpack.c.bf16 %v3125_v38, %v3125_v38 }
 0x211   : > { %v1994_v4 = vsel %vm1411_vm8, %v1947_v0, 0.0  ;;  %v2269_v8 = vshrl.u32 %v3065_v35, 16  ;;  %v2272_v32 = vshll.u32 %v3065_v35, 16  ;;  %v1893_v13 = vsel %vm1411_vm8, %v1800_v31, 0.0 }
 0x212   : > { %v2288_v55 = vrot.slane %v2286_v21, 7  ;;  %v1995_v52 = vadd.f32 %v1994_v4, %v1993_v60  ;;  %v1948_v59 = vmul.f32 %v1800_v31, %v1800_v31  ;;  %v3066_v61 = vpack.c.bf16 %v1800_v31, %v1800_v31  ;;  %v3005_v60 = vld [vmem:[%s4217_s13 + $0x74] sm:$0x1] }
 0x213   : > { %v2271_v30 = vrot.slane %v2269_v8, 7  ;;  %v1998_v63 = vsel %vm1411_vm8, %v1949_v40, 0.0  ;;  %v1897_v44 = vsel %vm1411_vm8, %v3125_v38, 0.0  ;;  %v2294_v57 = vshrl.u32 %v3068_v58, 16 }
 0x214   : > { %v2291_v18 = vor.u32 %v2289_v43, %v2288_v55  ;;  %v1950_v12 = vmul.f32 %v3125_v38, %v3125_v38  ;;  %v2297_v14 = vshll.u32 %v3068_v58, 16  ;;  %v1894_v53 = vadd.f32 %v1893_v13, %v1892_v10 }
 0x215   : > { %v2274_v47 = vor.u32 %v2272_v32, %v2271_v30  ;;  %v2296_v42 = vrot.slane %v2294_v57, 7  ;;  %v1996_v46 = vsel %vm1411_vm8, %v1948_v59, 0.0  ;;  %v2277_v48 = vshrl.u32 %v3066_v61, 16 }
 0x216   : > { %v2523_v34 = vsel %vm4345_vm7, %v2291_v18, %v3007_v15  ;;  %v2292_v16 = vrot.slane %v2288_v55, 4  ;;  %v1896_v5 = vadd.f32 %v1895_v1, %v1894_v53  ;;  %v1997_v24 = vadd.f32 %v1996_v46, %v1995_v52  ;;  %v3017_v18 = vld [vmem:[%s4217_s13 + $0x90] sm:$0xf]  ;;  %v3012_v53 = vld [vmem:[%s4217_s13 + $0x84] sm:$0xf] }
 0x217   : > { %3008 = vst [vmem:[%s4217_s13 + $0x78] sm:$0xf] %v2523_v34  ;;  %v2516_v17 = vsel %vm4345_vm7, %v2274_v47, %v3002_v54  ;;  %v2299_v27 = vor.u32 %v2297_v14, %v2296_v42  ;;  %v2301_v3 = vrot.slane %v2296_v42, 4  ;;  %v2279_v26 = vrot.slane %v2277_v48, 7 }
 0x218   : > { %3003 = vst [vmem:[%s4217_s13 + $0x6c] sm:$0xf] %v2516_v17  ;;  %v2280_v6 = vshll.u32 %v3066_v61, 16  ;;  %v2275_v22 = vrot.slane %v2271_v30, 4  ;;  %v2000_v51 = vsel %vm1411_vm8, %v1950_v12, 0.0  ;;  %v1999_v20 = vadd.f32 %v1998_v63, %v1997_v24 }
 0x219   : > { %v1898_v62 = vadd.f32 %v1897_v44, %v1896_v5  ;;  %v2300_v11 = vsel %vm4360_vm9, %v2292_v16, %v2299_v27  ;;  %v2527_v29 = vsel %vm4236_vm4, %v2301_v3, %v3010_v19  ;;  %v2284_v50 = vrot.slane %v2279_v26, 4 }
 0x21a   : > { %v2282_v25 = vor.u32 %v2280_v6, %v2279_v26  ;;  %3009 = vst.msk [vmem:[%s4217_s13 + $0x7c] sm:$0xf] %vm2453_vm0, %v2300_v11  ;;  %3011 = vst [vmem:[%s4217_s13 + $0x80] sm:$0x1] %v2527_v29  ;;  %v2001_v49 = vadd.f32 %v2000_v51, %v1999_v20  ;;  %v3020_v6 = vld [vmem:[%s4217_s13 + $0x98] sm:$0x1] }
 0x21b   : > { %v2520_v36 = vsel %vm4236_vm4, %v2284_v50, %v3005_v60 }
 0x21c   : > { %v2283_v39 = vsel %vm4360_vm9, %v2275_v22, %v2282_v25  ;;  %3006 = vst [vmem:[%s4217_s13 + $0x74] sm:$0x1] %v2520_v36 }
 0x21d   : > { %3004 = vst.msk [vmem:[%s4217_s13 + $0x70] sm:$0xf] %vm2453_vm0, %v2283_v39 }
 0x21e   : > { %v2608_v28 = vld [vmem:[%s4217_s13 + $0x78] sm:$0x1] }
 0x21f   : > { %v2609_v56 = vsel %vm4236_vm4, 0, %v2608_v28  ;;  %v2605_v2 = vld [vmem:[%s4217_s13 + $0x6c] sm:$0x1] }
 0x220   : > { %2610 = vst [vmem:[%s4217_s13 + $0x78] sm:$0x1] %v2609_v56  ;;  %v2606_v41 = vsel %vm4236_vm4, 0, %v2605_v2 }
 0x221   : > { %2607 = vst [vmem:[%s4217_s13 + $0x6c] sm:$0x1] %v2606_v41  ;;  %v2663_v7 = vld [vmem:[%s4217_s13 + $0x80] sm:$0x1] }
 0x222   : > { %v2664_v33 = vsel %vm4242_vm5, 0, %v2663_v7 }
 0x223   : > { %2665 = vst [vmem:[%s4217_s13 + $0x80] sm:$0x1] %v2664_v33  ;;  %v2660_v0 = vld [vmem:[%s4217_s13 + $0x74] sm:$0x1] }
 0x224   : > { %v2661_v35 = vsel %vm4242_vm5, 0, %v2660_v0 }
 0x225   : > { %2662 = vst [vmem:[%s4217_s13 + $0x74] sm:$0x1] %v2661_v35 }
 0x22d   : > { %v3128_v38 = vpop.f32.mrb[4].mxu1 }
 0x22e   : > { %v3071_v40 = vpack.c.bf16 %v3128_v38, %v3128_v38  ;;  %v1813_v21 = vpop.f32.mrb[5].mxu1  ;;  %v1953_v4 = vmul.f32 %v3128_v38, %v3128_v38  ;;  %v1903_v32 = vsel %vm1411_vm8, %v3128_v38, 0.0 }
 0x22f   : > { %v1899_v10 = vsel %vm1411_vm8, %v1813_v21, 0.0  ;;  %v1951_v31 = vmul.f32 %v1813_v21, %v1813_v21  ;;  %v3069_v1 = vpack.c.bf16 %v1813_v21, %v1813_v21  ;;  %v3129_v43 = vpop.f32.mrb[6].mxu1 }
 0x230   : > { %v2320_v8 = vshrl.u32 %v3071_v40, 16  ;;  %v1900_v55 = vadd.f32 %v1899_v10, %v1898_v62  ;;  %v1816_v52 = vpop.f32.mrb[7].mxu1  ;;  %v2323_v58 = vshll.u32 %v3071_v40, 16  ;;  %v3072_v63 = vpack.c.bf16 %v3129_v43, %v3129_v43 }
 0x231   : > { %v2002_v15 = vsel %vm1411_vm8, %v1951_v31, 0.0  ;;  %v2303_v30 = vshrl.u32 %v3069_v1, 16  ;;  %v2306_v61 = vshll.u32 %v3069_v1, 16  ;;  %v1901_v44 = vsel %vm1411_vm8, %v1816_v52, 0.0 }
 0x232   : > { %v2322_v13 = vrot.slane %v2320_v8, 7  ;;  %v2003_v59 = vadd.f32 %v2002_v15, %v2001_v49  ;;  %v1952_v57 = vmul.f32 %v1816_v52, %v1816_v52  ;;  %v3070_v47 = vpack.c.bf16 %v1816_v52, %v1816_v52  ;;  %v3015_v49 = vld [vmem:[%s4217_s13 + $0x8c] sm:$0x1] }
 0x233   : > { %v2305_v54 = vrot.slane %v2303_v30, 7  ;;  %v2006_v12 = vsel %vm1411_vm8, %v1953_v4, 0.0  ;;  %v1905_v34 = vsel %vm1411_vm8, %v3129_v43, 0.0  ;;  %v2328_v42 = vshrl.u32 %v3072_v63, 16 }
 0x234   : > { %v2325_v14 = vor.u32 %v2323_v58, %v2322_v13  ;;  %v1954_v48 = vmul.f32 %v3129_v43, %v3129_v43  ;;  %v2331_v16 = vshll.u32 %v3072_v63, 16  ;;  %v1902_v17 = vadd.f32 %v1901_v44, %v1900_v55 }
 0x235   : > { %v2308_v46 = vor.u32 %v2306_v61, %v2305_v54  ;;  %v2330_v5 = vrot.slane %v2328_v42, 7  ;;  %v2004_v24 = vsel %vm1411_vm8, %v1952_v57, 0.0  ;;  %v2311_v27 = vshrl.u32 %v3070_v47, 16 }
 0x236   : > { %v2537_v19 = vsel %vm4345_vm7, %v2325_v14, %v3017_v18  ;;  %v2326_v3 = vrot.slane %v2322_v13, 4  ;;  %v1904_v22 = vadd.f32 %v1903_v32, %v1902_v17  ;;  %v2005_v51 = vadd.f32 %v2004_v24, %v2003_v59  ;;  %v3027_v14 = vld [vmem:[%s4217_s13 + $0xa8] sm:$0xf]  ;;  %v3022_v17 = vld [vmem:[%s4217_s13 + $0x9c] sm:$0xf] }
 0x237   : > { %3018 = vst [vmem:[%s4217_s13 + $0x90] sm:$0xf] %v2537_v19  ;;  %v2530_v26 = vsel %vm4345_vm7, %v2308_v46, %v3012_v53  ;;  %v2333_v20 = vor.u32 %v2331_v16, %v2330_v5  ;;  %v2335_v60 = vrot.slane %v2330_v5, 4  ;;  %v2313_v62 = vrot.slane %v2311_v27, 7 }
 0x238   : > { %3013 = vst [vmem:[%s4217_s13 + $0x84] sm:$0xf] %v2530_v26  ;;  %v2314_v11 = vshll.u32 %v3070_v47, 16  ;;  %v2309_v29 = vrot.slane %v2305_v54, 4  ;;  %v2008_v25 = vsel %vm1411_vm8, %v1954_v48, 0.0  ;;  %v2007_v50 = vadd.f32 %v2006_v12, %v2005_v51 }
 0x239   : > { %v1906_v39 = vadd.f32 %v1905_v34, %v1904_v22  ;;  %v2334_v36 = vsel %vm4360_vm9, %v2326_v3, %v2333_v20  ;;  %v2541_v28 = vsel %vm4236_vm4, %v2335_v60, %v3020_v6  ;;  %v2318_v2 = vrot.slane %v2313_v62, 4 }
 0x23a   : > { %v2316_v56 = vor.u32 %v2314_v11, %v2313_v62  ;;  %3019 = vst.msk [vmem:[%s4217_s13 + $0x94] sm:$0xf] %vm2453_vm0, %v2334_v36  ;;  %3021 = vst [vmem:[%s4217_s13 + $0x98] sm:$0x1] %v2541_v28  ;;  %v2009_v41 = vadd.f32 %v2008_v25, %v2007_v50  ;;  %v3030_v11 = vld [vmem:[%s4217_s13 + $0xb0] sm:$0x1] }
 0x23b   : > { %v2534_v33 = vsel %vm4236_vm4, %v2318_v2, %v3015_v49 }
 0x23c   : > { %v2317_v7 = vsel %vm4360_vm9, %v2309_v29, %v2316_v56  ;;  %3016 = vst [vmem:[%s4217_s13 + $0x8c] sm:$0x1] %v2534_v33 }
 0x23d   : > { %3014 = vst.msk [vmem:[%s4217_s13 + $0x88] sm:$0xf] %vm2453_vm0, %v2317_v7 }
 0x23e   : > { %v2614_v0 = vld [vmem:[%s4217_s13 + $0x90] sm:$0x1] }
 0x23f   : > { %v2615_v35 = vsel %vm4236_vm4, 0, %v2614_v0  ;;  %v2611_v38 = vld [vmem:[%s4217_s13 + $0x84] sm:$0x1] }
 0x240   : > { %2616 = vst [vmem:[%s4217_s13 + $0x90] sm:$0x1] %v2615_v35  ;;  %v2612_v40 = vsel %vm4236_vm4, 0, %v2611_v38 }
 0x241   : > { %2613 = vst [vmem:[%s4217_s13 + $0x84] sm:$0x1] %v2612_v40  ;;  %v2669_v21 = vld [vmem:[%s4217_s13 + $0x98] sm:$0x1] }
 0x242   : > { %v2670_v10 = vsel %vm4242_vm5, 0, %v2669_v21 }
 0x243   : > { %2671 = vst [vmem:[%s4217_s13 + $0x98] sm:$0x1] %v2670_v10  ;;  %v2666_v31 = vld [vmem:[%s4217_s13 + $0x8c] sm:$0x1] }
 0x244   : > { %v2667_v1 = vsel %vm4242_vm5, 0, %v2666_v31 }
 0x245   : > { %2668 = vst [vmem:[%s4217_s13 + $0x8c] sm:$0x1] %v2667_v1 }
 0x24d   : > { %v3132_v43 = vpop.f32.mrb[8].mxu1 }
 0x24e   : > { %v3075_v4 = vpack.c.bf16 %v3132_v43, %v3132_v43  ;;  %v1829_v8 = vpop.f32.mrb[9].mxu1  ;;  %v1957_v15 = vmul.f32 %v3132_v43, %v3132_v43  ;;  %v1911_v61 = vsel %vm1411_vm8, %v3132_v43, 0.0 }
 0x24f   : > { %v1907_v55 = vsel %vm1411_vm8, %v1829_v8, 0.0  ;;  %v1955_v52 = vmul.f32 %v1829_v8, %v1829_v8  ;;  %v3073_v32 = vpack.c.bf16 %v1829_v8, %v1829_v8  ;;  %v3133_v58 = vpop.f32.mrb[10].mxu1 }
 0x250   : > { %v2354_v30 = vshrl.u32 %v3075_v4, 16  ;;  %v1908_v13 = vadd.f32 %v1907_v55, %v1906_v39  ;;  %v1832_v59 = vpop.f32.mrb[11].mxu1  ;;  %v2357_v63 = vshll.u32 %v3075_v4, 16  ;;  %v3076_v12 = vpack.c.bf16 %v3133_v58, %v3133_v58 }
 0x251   : > { %v2010_v18 = vsel %vm1411_vm8, %v1955_v52, 0.0  ;;  %v2337_v54 = vshrl.u32 %v3073_v32, 16  ;;  %v2340_v47 = vshll.u32 %v3073_v32, 16  ;;  %v1909_v34 = vsel %vm1411_vm8, %v1832_v59, 0.0 }
 0x252   : > { %v2356_v44 = vrot.slane %v2354_v30, 7  ;;  %v2011_v57 = vadd.f32 %v2010_v18, %v2009_v41  ;;  %v1956_v42 = vmul.f32 %v1832_v59, %v1832_v59  ;;  %v3074_v46 = vpack.c.bf16 %v1832_v59, %v1832_v59  ;;  %v3025_v41 = vld [vmem:[%s4217_s13 + $0xa4] sm:$0x1] }
 0x253   : > { %v2339_v53 = vrot.slane %v2337_v54, 7  ;;  %v2014_v48 = vsel %vm1411_vm8, %v1957_v15, 0.0  ;;  %v1913_v19 = vsel %vm1411_vm8, %v3133_v58, 0.0  ;;  %v2362_v5 = vshrl.u32 %v3076_v12, 16 }
 0x254   : > { %v2359_v16 = vor.u32 %v2357_v63, %v2356_v44  ;;  %v1958_v27 = vmul.f32 %v3133_v58, %v3133_v58  ;;  %v2365_v3 = vshll.u32 %v3076_v12, 16  ;;  %v1910_v26 = vadd.f32 %v1909_v34, %v1908_v13 }
 0x255   : > { %v2342_v24 = vor.u32 %v2340_v47, %v2339_v53  ;;  %v2364_v22 = vrot.slane %v2362_v5, 7  ;;  %v2012_v51 = vsel %vm1411_vm8, %v1956_v42, 0.0  ;;  %v2345_v20 = vshrl.u32 %v3074_v46, 16 }
 0x256   : > { %v2551_v6 = vsel %vm4345_vm7, %v2359_v16, %v3027_v14  ;;  %v2360_v60 = vrot.slane %v2356_v44, 4  ;;  %v1912_v29 = vadd.f32 %v1911_v61, %v1910_v26  ;;  %v2013_v25 = vadd.f32 %v2012_v51, %v2011_v57  ;;  %v3037_v16 = vld [vmem:[%s4217_s13 + $0xc0] sm:$0xf]  ;;  %v3032_v26 = vld [vmem:[%s4217_s13 + $0xb4] sm:$0xf] }
 0x257   : > { %3028 = vst [vmem:[%s4217_s13 + $0xa8] sm:$0xf] %v2551_v6  ;;  %v2544_v62 = vsel %vm4345_vm7, %v2342_v24, %v3022_v17  ;;  %v2367_v50 = vor.u32 %v2365_v3, %v2364_v22  ;;  %v2369_v49 = vrot.slane %v2364_v22, 4  ;;  %v2347_v39 = vrot.slane %v2345_v20, 7 }
 0x258   : > { %3023 = vst [vmem:[%s4217_s13 + $0x9c] sm:$0xf] %v2544_v62  ;;  %v2348_v36 = vshll.u32 %v3074_v46, 16  ;;  %v2343_v28 = vrot.slane %v2339_v53, 4  ;;  %v2016_v56 = vsel %vm1411_vm8, %v1958_v27, 0.0  ;;  %v2015_v2 = vadd.f32 %v2014_v48, %v2013_v25 }
 0x259   : > { %v1914_v7 = vadd.f32 %v1913_v19, %v1912_v29  ;;  %v2368_v33 = vsel %vm4360_vm9, %v2360_v60, %v2367_v50  ;;  %v2555_v0 = vsel %vm4236_vm4, %v2369_v49, %v3030_v11  ;;  %v2352_v38 = vrot.slane %v2347_v39, 4 }
 0x25a   : > { %v2350_v35 = vor.u32 %v2348_v36, %v2347_v39  ;;  %3029 = vst.msk [vmem:[%s4217_s13 + $0xac] sm:$0xf] %vm2453_vm0, %v2368_v33  ;;  %3031 = vst [vmem:[%s4217_s13 + $0xb0] sm:$0x1] %v2555_v0  ;;  %v2017_v40 = vadd.f32 %v2016_v56, %v2015_v2  ;;  %v3040_v36 = vld [vmem:[%s4217_s13 + $0xc8] sm:$0x1] }
 0x25b   : > { %v2548_v10 = vsel %vm4236_vm4, %v2352_v38, %v3025_v41 }
 0x25c   : > { %v2351_v21 = vsel %vm4360_vm9, %v2343_v28, %v2350_v35  ;;  %3026 = vst [vmem:[%s4217_s13 + $0xa4] sm:$0x1] %v2548_v10 }
 0x25d   : > { %3024 = vst.msk [vmem:[%s4217_s13 + $0xa0] sm:$0xf] %vm2453_vm0, %v2351_v21 }
 0x25e   : > { %v2620_v31 = vld [vmem:[%s4217_s13 + $0xa8] sm:$0x1] }
 0x25f   : > { %v2621_v1 = vsel %vm4236_vm4, 0, %v2620_v31  ;;  %v2617_v43 = vld [vmem:[%s4217_s13 + $0x9c] sm:$0x1] }
 0x260   : > { %2622 = vst [vmem:[%s4217_s13 + $0xa8] sm:$0x1] %v2621_v1  ;;  %v2618_v4 = vsel %vm4236_vm4, 0, %v2617_v43 }
 0x261   : > { %2619 = vst [vmem:[%s4217_s13 + $0x9c] sm:$0x1] %v2618_v4  ;;  %v2675_v8 = vld [vmem:[%s4217_s13 + $0xb0] sm:$0x1] }
 0x262   : > { %v2676_v55 = vsel %vm4242_vm5, 0, %v2675_v8 }
 0x263   : > { %2677 = vst [vmem:[%s4217_s13 + $0xb0] sm:$0x1] %v2676_v55  ;;  %v2672_v52 = vld [vmem:[%s4217_s13 + $0xa4] sm:$0x1] }
 0x264   : > { %v2673_v32 = vsel %vm4242_vm5, 0, %v2672_v52 }
 0x265   : > { %2674 = vst [vmem:[%s4217_s13 + $0xa4] sm:$0x1] %v2673_v32 }
 0x26e   : > { %v3136_v58 = vpop.f32.mrb[12].mxu1 }
 0x26f   : > { %v3079_v15 = vpack.c.bf16 %v3136_v58, %v3136_v58  ;;  %v1845_v30 = vpop.f32.mrb[13].mxu1  ;;  %v1961_v18 = vmul.f32 %v3136_v58, %v3136_v58  ;;  %v1919_v47 = vsel %vm1411_vm8, %v3136_v58, 0.0 }
 0x270   : > { %v1915_v13 = vsel %vm1411_vm8, %v1845_v30, 0.0  ;;  %v1959_v59 = vmul.f32 %v1845_v30, %v1845_v30  ;;  %v3077_v61 = vpack.c.bf16 %v1845_v30, %v1845_v30  ;;  %v3137_v63 = vpop.f32.mrb[14].mxu1 }
 0x271   : > { %v2388_v54 = vshrl.u32 %v3079_v15, 16  ;;  %v1916_v44 = vadd.f32 %v1915_v13, %v1914_v7  ;;  %v1848_v57 = vpop.f32.mrb[15].mxu1  ;;  %v2391_v12 = vshll.u32 %v3079_v15, 16  ;;  %v3080_v48 = vpack.c.bf16 %v3137_v63, %v3137_v63 }
 0x272   : > { %v2018_v14 = vsel %vm1411_vm8, %v1959_v59, 0.0  ;;  %v2371_v53 = vshrl.u32 %v3077_v61, 16  ;;  %v2374_v46 = vshll.u32 %v3077_v61, 16  ;;  %v1917_v19 = vsel %vm1411_vm8, %v1848_v57, 0.0 }
 0x273   : > { %v2390_v34 = vrot.slane %v2388_v54, 7  ;;  %v2019_v42 = vadd.f32 %v2018_v14, %v2017_v40  ;;  %v1960_v5 = vmul.f32 %v1848_v57, %v1848_v57  ;;  %v3078_v24 = vpack.c.bf16 %v1848_v57, %v1848_v57 }
 0x274   : > { %v2373_v17 = vrot.slane %v2371_v53, 7  ;;  %v2022_v27 = vsel %vm1411_vm8, %v1961_v18, 0.0  ;;  %v1921_v6 = vsel %vm1411_vm8, %v3137_v63, 0.0  ;;  %v2396_v22 = vshrl.u32 %v3080_v48, 16 }
 0x275   : > { %v2393_v3 = vor.u32 %v2391_v12, %v2390_v34  ;;  %v1962_v20 = vmul.f32 %v3137_v63, %v3137_v63  ;;  %v2399_v60 = vshll.u32 %v3080_v48, 16  ;;  %v1918_v62 = vadd.f32 %v1917_v19, %v1916_v44 }
 0x276   : > { %v2376_v51 = vor.u32 %v2374_v46, %v2373_v17  ;;  %v2398_v29 = vrot.slane %v2396_v22, 7  ;;  %v2020_v25 = vsel %vm1411_vm8, %v1960_v5, 0.0  ;;  %v2379_v50 = vshrl.u32 %v3078_v24, 16 }
 0x277   : > { %v2565_v11 = vsel %vm4345_vm7, %v2393_v3, %v3037_v16  ;;  %v2394_v49 = vrot.slane %v2390_v34, 4  ;;  %v1920_v28 = vadd.f32 %v1919_v47, %v1918_v62  ;;  %v2021_v56 = vadd.f32 %v2020_v25, %v2019_v42 }
 0x278   : > { %3038 = vst [vmem:[%s4217_s13 + $0xc0] sm:$0xf] %v2565_v11  ;;  %v2558_v39 = vsel %vm4345_vm7, %v2376_v51, %v3032_v26  ;;  %v2401_v2 = vor.u32 %v2399_v60, %v2398_v29  ;;  %v2403_v41 = vrot.slane %v2398_v29, 4  ;;  %v2381_v7 = vrot.slane %v2379_v50, 7 }
 0x279   : > { %3033 = vst [vmem:[%s4217_s13 + $0xb4] sm:$0xf] %v2558_v39  ;;  %v2382_v33 = vshll.u32 %v3078_v24, 16  ;;  %v2377_v0 = vrot.slane %v2373_v17, 4  ;;  %v2024_v35 = vsel %vm1411_vm8, %v1962_v20, 0.0  ;;  %v1922_v38 = vadd.f32 %v1921_v6, %v1920_v28 }
 0x27a   : > { %v2023_v40 = vadd.f32 %v2022_v27, %v2021_v56  ;;  %v2402_v21 = vsel %vm4360_vm9, %v2394_v49, %v2401_v2  ;;  %v2569_v10 = vsel %vm4236_vm4, %v2403_v41, %v3040_v36  ;;  %v2386_v1 = vrot.slane %v2381_v7, 4 }
 0x27b   : > { %v2384_v31 = vor.u32 %v2382_v33, %v2381_v7  ;;  %3039 = vst.msk [vmem:[%s4217_s13 + $0xc4] sm:$0xf] %vm2453_vm0, %v2402_v21  ;;  %3041 = vst [vmem:[%s4217_s13 + $0xc8] sm:$0x1] %v2569_v10  ;;  %v1923_v43 = vrot.slane %v1922_v38, 4 }
 0x27c   : > { %v2025_v4 = vadd.f32 %v2024_v35, %v2023_v40  ;;  %v2562_v55 = vsel %vm4236_vm4, %v2386_v1, %v3035_v37 }
 0x27d   : > { %v2385_v8 = vsel %vm4360_vm9, %v2377_v0, %v2384_v31  ;;  %v1924_v52 = vadd.f32 %v1923_v43, %v1922_v38  ;;  %3036 = vst [vmem:[%s4217_s13 + $0xbc] sm:$0x1] %v2562_v55 }
 0x27e   : > { %v2026_v32 = vrot.slane %v2025_v4, 4  ;;  %3034 = vst.msk [vmem:[%s4217_s13 + $0xb8] sm:$0xf] %vm2453_vm0, %v2385_v8 }
 0x27f   : > { %v2626_v58 = vld [vmem:[%s4217_s13 + $0xc0] sm:$0x1]  ;;  %v1925_v30 = vrot.slane %v1924_v52, 2 }
 0x280   : > { %v2627_v15 = vsel %vm4236_vm4, 0, %v2626_v58  ;;  %v2623_v23 = vld [vmem:[%s4217_s13 + $0xb4] sm:$0x1]  ;;  %v2027_v13 = vadd.f32 %v2026_v32, %v2025_v4 }
 0x281   : > { %2628 = vst [vmem:[%s4217_s13 + $0xc0] sm:$0x1] %v2627_v15  ;;  %v2624_v59 = vsel %vm4236_vm4, 0, %v2623_v23  ;;  %v1926_v61 = vadd.f32 %v1925_v30, %v1924_v52 }
 0x282   : > { %2625 = vst [vmem:[%s4217_s13 + $0xb4] sm:$0x1] %v2624_v59  ;;  %v2028_v63 = vrot.slane %v2027_v13, 2  ;;  %v2681_v18 = vld [vmem:[%s4217_s13 + $0xc8] sm:$0x1] }
 0x283   : > { %v2682_v54 = vsel %vm4242_vm5, 0, %v2681_v18  ;;  %v1927_v44 = vrot.slane %v1926_v61, 1 }
 0x284   : > { %v2029_v57 = vadd.f32 %v2028_v63, %v2027_v13  ;;  %2683 = vst [vmem:[%s4217_s13 + $0xc8] sm:$0x1] %v2682_v54  ;;  %v2678_v47 = vld [vmem:[%s4217_s13 + $0xbc] sm:$0x1] }
 0x285   : > { %v2679_v9 = vsel %vm4242_vm5, 0, %v2678_v47  ;;  %v1928_v12 = vadd.f32 %v1927_v44, %v1926_v61 }
 0x286   : > { %v2030_v14 = vrot.slane %v2029_v57, 1  ;;  %2680 = vst [vmem:[%s4217_s13 + $0xbc] sm:$0x1] %v2679_v9 }
 0x287   : > { %1930 = vst.msk [vmem:[%s254_s14] sm:$0x1] %vm1929_vm1, %v1928_v12 }
 0x288   : > { %v2031_v53 = vadd.f32 %v2030_v14, %v2029_v57 }
 0x289   : > { %3234 = shalt.err (!%p3231_p3)
}
 0x28a   : > { %s3235_s13 = scalar_lea.hbm %s4749_s19, 16  ;;  %s3239_s18 = scalar_lea.hbm %s4831_s5, 32 }
 0x28b   : > { %p3236_p4 = scmp.ne.s32.totalorder %s4749_s19, %s3235_s13  ;;  %p3240_p9 = scmp.lt.u32.totalorder %s4749_s19, %s4831_s5 }
 0x28c   : > { %p3241_p10 = scmp.lt.u32.totalorder %s3239_s18, %s3235_s13  ;;  %p3243_p12 = scmp.lt.u32.totalorder %s3235_s13, %s4749_s19 }
 0x28d   : > { %p3237_p7 = pnand %p3236_p4, %p3401_p5 }
 0x28e   : > { %p3242_p11 = por %p3241_p10, %p3240_p9 }
 0x28f   : > { %p3238_p8 = pneg %p3237_p7 }
 0x290   : > { %p3244_p13 = por %p3243_p12, %p3242_p11 }
 0x292   : > { %p3245_p0 = pnand %p3244_p13, %p3238_p8 }
 0x294   : > { %3248 = shalt.err (!%p3245_p0)
}
 0x295   : > { %3147 = dma.vmem_to_hbm [thread:$0]  (%p3401_p5), %s4751_s15, 16, %s4749_s19, %s2693_s27   ;;  %2032 = vst.msk [vmem:[%s260_s16] sm:$0x1] %vm1929_vm1, %v2031_v53 }
 0x296   : > { %s2697_s24 = scalar_lea.sflag [#allocation5], %s4721_s7  ;;  %s3249_s9 = scalar_lea.vmem %s4760_s17, 16 }
 0x297   : > { %p3250_p1 = scmp.ne.s32.totalorder %s4760_s17, %s3249_s9  ;;  %s3327_s10 = smov [#allocation4]  }
 0x298   : > { %s3253_s11 = sshll.u32 %s3327_s10, 4  ;;  %s3254_s11 = int_to_ptr.vmem [resolvable:$false] %s3253_s11 }
 0x299   : > { %p3251_p2 = pnand %p3250_p1, %p3401_p5  ;;  %s3255_s12 = scalar_lea.vmem %s3254_s11, 32 }
 0x29a   : > { %p3256_p4 = scmp.lt.s32.totalorder %s4760_s17, %s3254_s11  ;;  %p3257_p7 = scmp.lt.s32.totalorder %s3255_s12, %s3249_s9 }
 0x29b   : > { %p3252_p3 = pneg %p3251_p2 }
 0x29c   : > { %p3258_p8 = por %p3257_p7, %p3256_p4 }
 0x29e   : > { %p3259_p9 = pnand %p3258_p8, %p3252_p3 }
 0x2a0   : > { %3262 = shalt.err (!%p3259_p9)
}
 0x2a1   : > { %s3263_s7 = scalar_lea.hbm %s4758_s26, 16  ;;  %s3267_s19 = scalar_lea.hbm %s4832_s6, 32 }
 0x2a2   : > { %p3264_p10 = scmp.ne.s32.totalorder %s4758_s26, %s3263_s7  ;;  %p3268_p13 = scmp.lt.u32.totalorder %s4758_s26, %s4832_s6 }
 0x2a3   : > { %p3269_p0 = scmp.lt.u32.totalorder %s3267_s19, %s3263_s7  ;;  %p3271_p2 = scmp.lt.u32.totalorder %s3263_s7, %s4758_s26 }
 0x2a4   : > { %p3265_p11 = pnand %p3264_p10, %p3401_p5 }
 0x2a5   : > { %p3270_p1 = por %p3269_p0, %p3268_p13 }
 0x2a6   : > { %p3266_p12 = pneg %p3265_p11 }
 0x2a7   : > { %p3272_p3 = por %p3271_p2, %p3270_p1 }
 0x2a9   : > { %p3273_p4 = pnand %p3272_p3, %p3266_p12 }
 0x2ab   : > { %3276 = shalt.err (!%p3273_p4)
}
 0x2ac   : > { %3148 = dma.vmem_to_hbm [thread:$0]  (%p3401_p5), %s4760_s17, 16, %s4758_s26, %s2697_s24  }
 0x2ad PF: > { %p3158_p7 = scmp.ge.s32.totalorder %s3315_s3, 2  ;;  %s2745_s8 = sand.u32 1, %s3303_s21  }
 0x2ae   : > { %s2746_s14 = scalar_lea.sflag [#allocation3], %s2745_s8 }
 0x2af   : > { %p3152_p8 = pnand %p3158_p7, %p3405_p6 }
 0x2b1   : > { %3294 = dma.done.wait (!%p3152_p8), %s2746_s14, 16  }
 0x2b2   : > { %3296 = vsyncadd (!%p3152_p8), %s2746_s14, 4294967280  ;;  %s2754_s18 = scalar_lea.sflag [#allocation5], %s2745_s8 }
 0x2b3   : > { %3298 = dma.done.wait (!%p3152_p8), %s2754_s18, 16  }
 0x2b4   : > { %3300 = vsyncadd (!%p3152_p8), %s2754_s18, 4294967280  ;;  %p20_p5 = scmp.ge.s32.totalorder %s3388_s25, 4   ;;  %s4847_s21 = smov %s3307_s22 }
 0x2b5   : > { %s4848_s22 = smov %s3311_s2  ;;  %s4849_s2 = smov %s3399_s28 }
 0x2b6   : > { %s4850_s3 = smov %s3388_s25  ;;  %22 = sbr.rel (!%p20_p5) target bundleno = 5 (0x5), region = 102 }
 0x2bd   :  { %2758 = vsyncpa [#allocation3], 1 }
 0x2be   :  { %2760 = vsyncpa [#allocation3 + $0x1], 1 }
 0x2bf   :  { %2761 = vsyncpa [#allocation5], 1 }
 0x2c0   :  { %2763 = vsyncpa [#allocation5 + $0x1], 1 }

</bundles_post_ra>
